<compile_context>
chip_gen: v7x
topology: tpu7x:2x2x1
jax: 0.10.0
libtpu: 0.0.40
codegen_flags: <defaults>
</compile_context>

<pallas_src>
import functools

import jax
import jax.numpy as jnp
from jax import lax
from jax.experimental import pallas as pl
from jax.experimental.pallas import tpu as pltpu

# ----------------------- small config consistent with MLA.forward -----------------------
B = 2                                   # batch
S = 8                                   # seq
D_MODEL = 32
NUM_HEADS = 4
HEAD_DIM = D_MODEL // NUM_HEADS         # 8 (output reshape to d_model requires H*head_dim == d_model)
D_CQ = D_MODEL                          # reference applies W_QR (d_model -> ...) to c_Q -> d_cq == d_model
D_CKV = 16
HEAD_DIM_DECOUPLED = HEAD_DIM // 2      # 4
SCALE = (HEAD_DIM + HEAD_DIM_DECOUPLED) ** -0.5


# ----------------------------------- fused Pallas kernel --------------------------------
def _mla_fused_kernel(x_ref, w_in_ref, w_q_ref, w_kv_ref, w_o_ref, cos_ref, sin_ref, o_ref,
                      *, batch, seq_len, num_heads, head_dim, d_cq, d_ckv, scale):
    """Whole MLA forward (both batch elements): projections + RoPE + causal attention + W_O."""
    bs_rows, d_model = x_ref.shape                   # [B*S, D]
    H, hd = num_heads, head_dim
    half = hd // 2
    HH = H * hd
    Hhalf = H * half
    bf16, f32 = jnp.bfloat16, jnp.float32

    # ---- fused down-projections for ALL rows (both batch elements) in one MXU pass ----
    x_bf = x_ref[...].astype(bf16)                                          # [B*S, D]
    h_in = jnp.dot(x_bf, w_in_ref[...], preferred_element_type=f32)         # [B*S, d_cq+d_ckv+hd]
    c_q = h_in[:, :d_cq]
    c_kv = h_in[:, d_cq:d_cq + d_ckv]
    k_r = h_in[:, d_cq + d_ckv:]          # [B*S, hd], already de-interleaved ([evens | odds])

    # ---- fused up-projections (bf16 MXU inputs, f32 accumulation) ----
    qq = jnp.dot(c_q.astype(bf16), w_q_ref[...], preferred_element_type=f32)    # [B*S, 2*H*hd]
    kv = jnp.dot(c_kv.astype(bf16), w_kv_ref[...], preferred_element_type=f32)  # [B*S, 2*H*hd]
    q_c = qq[:, :HH]
    q_r = qq[:, HH:]                      # layout = [all evens | all odds], head-major (baked offline)
    k_c = kv[:, :HH]
    v = kv[:, HH:]

    # RoPE tables (f32), per-head tiled to match the head-major [evens | odds] layout of q_r
    cos_t = cos_ref[...]                  # [S, H*half]
    sin_t = sin_ref[...]
    cos1, sin1 = cos_t[:, :half], sin_t[:, :half]

    # causal mask built once, reused across batches and heads
    row = lax.broadcasted_iota(jnp.int32, (seq_len, seq_len), 0)
    col = lax.broadcasted_iota(jnp.int32, (seq_len, seq_len), 1)
    causal = col <= row

    cdims = (((1,), (1,)), ((), ()))      # contract last dims of both operands (no transpose)

    ctx_rows = []
    for b in range(batch):                # static unroll over 2 batch elements (sublane-aligned slices)
        r0 = b * seq_len
        r1 = r0 + seq_len

        # ---- RoPE (f32): all query heads at once; shared decoupled key rotated once per batch ----
        q_r_b = q_r[r0:r1]
        qe, qo = q_r_b[:, :Hhalf], q_r_b[:, Hhalf:]
        qre = qe * cos_t - qo * sin_t                 # [S, H*half]
        qro = qe * sin_t + qo * cos_t
        k_r_b = k_r[r0:r1]
        ke, ko = k_r_b[:, :half], k_r_b[:, half:]
        kre = ke * cos1 - ko * sin1                   # [S, half]
        kro = ke * sin1 + ko * cos1
        k_rot = jnp.concatenate([kre, kro], axis=-1)  # [S, hd], shared by all heads

        q_c_b = q_c[r0:r1]
        k_c_b = k_c[r0:r1]
        v_b = v[r0:r1]

        ctx_heads = []
        for h in range(H):                # static unroll; fine at H=4 (see TODO at top for large H)
            # concat([q_C, rope(q_R)]) . concat([k_C, rope(k_R)]) as ONE K=16 contraction per head
            qh = jnp.concatenate([q_c_b[:, h * hd:(h + 1) * hd],
                                  qre[:, h * half:(h + 1) * half],
                                  qro[:, h * half:(h + 1) * half]], axis=-1)     # [S, hd + hd/2 *2? -> 16]
            kh = jnp.concatenate([k_c_b[:, h * hd:(h + 1) * hd], k_rot], axis=-1)
            s = lax.dot_general(qh.astype(bf16), kh.astype(bf16), cdims,
                                preferred_element_type=f32) * scale
            s = jnp.where(causal, s, -1e30)

            # softmax (f32): EUP approximate reciprocal + one Newton step (~f32 accuracy)
            m = jnp.max(s, axis=-1, keepdims=True)
            p = jnp.exp(s - m)
            den = jnp.sum(p, axis=-1, keepdims=True)
            inv = pl.reciprocal(den, approx=True)
            inv = inv * (2.0 - den * inv)

            ctx = jnp.dot(p.astype(bf16), v_b[:, h * hd:(h + 1) * hd].astype(bf16),
                          preferred_element_type=f32) * inv                       # [S, hd]
            ctx_heads.append(ctx)

        ctx_rows.append(jnp.concatenate(ctx_heads, axis=-1))                      # [S, H*hd]

    # single output projection for both batch elements: [B*S, H*hd] @ [H*hd, D]
    ctx_full = jnp.concatenate(ctx_rows, axis=0)                                  # [B*S, H*hd]
    # attn_dropout / res_dropout: identity in eval mode (dropout_p = 0)
    o_ref[...] = jnp.dot(ctx_full.astype(bf16), w_o_ref[...], preferred_element_type=f32)


def mla_forward(fused, x, cos_t, sin_t):
    """Fused MLA forward.  fused: pre-fused bf16 / RoPE-permutation-baked weights (see fuse_params)."""
    Bb, s_len, D = x.shape
    x2 = x.reshape(Bb * s_len, D)     # fold batch into M: one MXU pass over all rows, one grid step

    kern = functools.partial(_mla_fused_kernel, batch=Bb, seq_len=s_len,
                             num_heads=NUM_HEADS, head_dim=HEAD_DIM,
                             d_cq=D_CQ, d_ckv=D_CKV, scale=SCALE)

    def full_spec(a):
        # whole array VMEM-resident (total footprint here < 25 KB); see TODO at top for real sizes
        return pl.BlockSpec(a.shape, lambda i: (0,) * a.ndim)

    out2 = pl.pallas_call(
        kern,
        out_shape=jax.ShapeDtypeStruct((Bb * s_len, D), jnp.float32),
        grid=(1,),                    # single grid step: per-step / per-core overhead dominates at this size
        in_specs=[full_spec(x2),
                  full_spec(fused["W_IN"]), full_spec(fused["W_Q"]),
                  full_spec(fused["W_KV"]), full_spec(fused["W_O"]),
                  full_spec(cos_t), full_spec(sin_t)],
        out_specs=pl.BlockSpec((Bb * s_len, D), lambda i: (0, 0)),
        compiler_params=pltpu.CompilerParams(
            dimension_semantics=("arbitrary",),
            vmem_limit_bytes=32 * 1024 * 1024),
    )(x2, fused["W_IN"], fused["W_Q"], fused["W_KV"], fused["W_O"], cos_t, sin_t)
    return out2.reshape(Bb, s_len, D)


# -------------------- offline weight fusion + RoPE permutation baking -------------------
def fuse_params(params):
    """Concatenate weights sharing an input, bake the RoPE even/odd de-interleave into the output
    columns of W_QR / W_KR, and cast to bf16 for the MXU (done once; free at run time)."""
    H, hd, half = NUM_HEADS, HEAD_DIM, HEAD_DIM // 2
    d_model, d_cq = params["W_DQ"].shape
    # the reference applies W_QR (a d_model -> H*hd projection) to c_Q; only valid if d_cq == d_model
    assert d_cq == d_model, f"reference MLA.forward requires d_cq == d_model (got {d_cq} vs {d_model})"
    # target layout for q_R: [head0 evens, head1 evens, ... | head0 odds, head1 odds, ...]
    qr_src = ([h * hd + 2 * p for h in range(H) for p in range(half)]
              + [h * hd + 2 * p + 1 for h in range(H) for p in range(half)])
    kr_src = [2 * p for p in range(half)] + [2 * p + 1 for p in range(half)]
    w_qr_b = params["W_QR"][:, jnp.array(qr_src, dtype=jnp.int32)]
    w_kr_b = params["W_KR"][:, jnp.array(kr_src, dtype=jnp.int32)]
    bf16 = jnp.bfloat16
    return {
        "W_IN": jnp.concatenate([params["W_DQ"], params["W_DWK"], w_kr_b], axis=1).astype(bf16),
        "W_Q": jnp.concatenate([params["W_UQ"], w_qr_b], axis=1).astype(bf16),
        "W_KV": jnp.concatenate([params["W_UK"], params["W_UV"]], axis=1).astype(bf16),
        "W_O": params["W_O"].astype(bf16),
    }


# -------------------------------- pure-JAX f32 reference ---------------------------------
def _rope_ref(x, cos, sin):
    *lead, s_len, hd = x.shape
    xr = x.reshape(*lead, s_len, hd // 2, 2)
    xe, xo = xr[..., 0], xr[..., 1]
    oe = xe * cos - xo * sin
    oi = xe * sin + xo * cos
    return jnp.stack([oe, oi], axis=-1).reshape(*lead, s_len, hd)


def mla_forward_ref(params, x, cos, sin):
    Bb, s_len, D = x.shape
    H, hd = NUM_HEADS, HEAD_DIM
    xf = x.reshape(Bb * s_len, D)
    c_Q = xf @ params["W_DQ"]
    c_KV = xf @ params["W_DWK"]
    q_C = (c_Q @ params["W_UQ"]).reshape(Bb, s_len, H, hd).transpose(0, 2, 1, 3)
    k_C = (c_KV @ params["W_UK"]).reshape(Bb, s_len, H, hd).transpose(0, 2, 1, 3)
    v = (c_KV @ params["W_UV"]).reshape(Bb, s_len, H, hd).transpose(0, 2, 1, 3)
    q_R = (c_Q @ params["W_QR"]).reshape(Bb, s_len, H, hd).transpose(0, 2, 1, 3)
    k_R = (xf @ params["W_KR"]).reshape(Bb, 1, s_len, hd)
    q_R = _rope_ref(q_R, cos, sin)
    k_R = jnp.broadcast_to(_rope_ref(k_R, cos, sin), (Bb, H, s_len, hd))
    q = jnp.concatenate([q_C, q_R], axis=-1)
    k = jnp.concatenate([k_C, k_R], axis=-1)
    scores = jnp.einsum("bhqd,bhkd->bhqk", q, k) * SCALE
    causal = jnp.tril(jnp.ones((s_len, s_len), dtype=bool))
    scores = jnp.where(causal, scores, -1e30)
    p = jax.nn.softmax(scores, axis=-1)
    out = jnp.einsum("bhqk,bhkd->bhqd", p, v)
    out = out.transpose(0, 2, 1, 3).reshape(Bb * s_len, D)
    return (out @ params["W_O"]).reshape(Bb, s_len, D)


# --------------------------------------- main -------------------------------------------
if __name__ == "__main__":
    key = jax.random.PRNGKey(0)
    keys = jax.random.split(key, 9)

    def w(k, shape):
        return 0.1 * jax.random.normal(k, shape, dtype=jnp.float32)

    params = {
        "W_DQ": w(keys[0], (D_MODEL, D_CQ)),
        "W_DWK": w(keys[1], (D_MODEL, D_CKV)),
        "W_UQ": w(keys[2], (D_CQ, NUM_HEADS * HEAD_DIM)),
        "W_UK": w(keys[3], (D_CKV, NUM_HEADS * HEAD_DIM)),
        "W_UV": w(keys[4], (D_CKV, NUM_HEADS * HEAD_DIM)),
        "W_QR": w(keys[5], (D_CQ, NUM_HEADS * HEAD_DIM)),
        "W_KR": w(keys[6], (D_MODEL, HEAD_DIM)),
        "W_O": w(keys[7], (D_MODEL, D_MODEL)),
    }

    x = jax.random.normal(keys[8], (B, S, D_MODEL), dtype=jnp.float32)

    # pos_info (freq_cis) as cos/sin tables: theta_i = 10000^(-2i/head_dim), angle = pos * theta_i
    inv_freq = 1.0 / (10000.0 ** (jnp.arange(0, HEAD_DIM, 2, dtype=jnp.float32) / HEAD_DIM))
    angles = jnp.arange(S, dtype=jnp.float32)[:, None] * inv_freq[None, :]     # [S, head_dim // 2]
    cos, sin = jnp.cos(angles), jnp.sin(angles)
    # cos/sin tiled per head to match the head-major [evens | odds] layout baked into W_QR
    cos_t = jnp.tile(cos, (1, NUM_HEADS))   # [S, H * head_dim // 2]
    sin_t = jnp.tile(sin, (1, NUM_HEADS))

    # offline weight fusion / RoPE permutation baking / bf16 cast (done once, not per forward)
    fused = fuse_params(params)

    out = jax.block_until_ready(jax.jit(mla_forward)(fused, x, cos_t, sin_t))
    ref = mla_forward_ref(params, x, cos, sin)

    assert out.shape == (B, S, D_MODEL), out.shape
    # tolerance 4e-2: the MXU operands are bf16 (per perf review); the softmax reciprocal itself is
    # ~f32-exact thanks to the Newton refinement after pl.reciprocal(approx=True).
    assert jnp.allclose(out, ref, atol=4e-2, rtol=4e-2), float(jnp.max(jnp.abs(out - ref)))
    print("KERNEL_OK")
</pallas_src>

<mosaic_0001>
module attributes {stable_mosaic.version = 11 : i64} {
  func.func @_mla_fused_kernel(%arg0: i32, %arg1: memref<16x32xf32, #tpu.memory_space<vmem>>, %arg2: memref<32x56xbf16, #tpu.memory_space<vmem>>, %arg3: memref<32x64xbf16, #tpu.memory_space<vmem>>, %arg4: memref<16x64xbf16, #tpu.memory_space<vmem>>, %arg5: memref<32x32xbf16, #tpu.memory_space<vmem>>, %arg6: memref<8x16xf32, #tpu.memory_space<vmem>>, %arg7: memref<8x16xf32, #tpu.memory_space<vmem>>, %arg8: memref<16x32xf32, #tpu.memory_space<vmem>>) attributes {dimension_semantics = [#tpu.dimension_semantics<arbitrary>], iteration_bounds = array<i64: 1>, scalar_prefetch = 0 : i64, scratch_operands = 0 : i64, tpu.core_type = #tpu.core_type<tc>, window_params = [{pipeline_mode = #tpu.pipeline_mode<synchronous>, transform_indices = @transform_0, window_bounds = array<i64: 16, 32>}, {pipeline_mode = #tpu.pipeline_mode<synchronous>, transform_indices = @transform_1, window_bounds = array<i64: 32, 56>}, {pipeline_mode = #tpu.pipeline_mode<synchronous>, transform_indices = @transform_2, window_bounds = array<i64: 32, 64>}, {pipeline_mode = #tpu.pipeline_mode<synchronous>, transform_indices = @transform_3, window_bounds = array<i64: 16, 64>}, {pipeline_mode = #tpu.pipeline_mode<synchronous>, transform_indices = @transform_4, window_bounds = array<i64: 32, 32>}, {pipeline_mode = #tpu.pipeline_mode<synchronous>, transform_indices = @transform_5, window_bounds = array<i64: 8, 16>}, {pipeline_mode = #tpu.pipeline_mode<synchronous>, transform_indices = @transform_6, window_bounds = array<i64: 8, 16>}, {pipeline_mode = #tpu.pipeline_mode<synchronous>, transform_indices = @transform_7, window_bounds = array<i64: 16, 32>}]} {
    %c0 = arith.constant 0 : index
    %c0_0 = arith.constant 0 : index
    %0 = vector.load %arg1[%c0, %c0_0] : memref<16x32xf32, #tpu.memory_space<vmem>>, vector<16x32xf32>
    %1 = arith.truncf %0 : vector<16x32xf32> to vector<16x32xbf16>
    %c0_1 = arith.constant 0 : index
    %c0_2 = arith.constant 0 : index
    %2 = vector.load %arg2[%c0_1, %c0_2] : memref<32x56xbf16, #tpu.memory_space<vmem>>, vector<32x56xbf16>
    %cst = arith.constant dense<0.000000e+00> : vector<16x56xf32>
    %3 = tpu.matmul %1, %2, %cst {dimension_numbers = #tpu.dot_dimension_numbers<[1], [0], [0], [1], [0, 0, 1, 1], [], []>} : vector<16x32xbf16>, vector<32x56xbf16>, vector<16x56xf32> -> vector<16x56xf32>
    %4 = vector.extract_strided_slice %3 {offsets = [0, 0], sizes = [16, 32], strides = [1, 1]} : vector<16x56xf32> to vector<16x32xf32>
    %5 = vector.extract_strided_slice %3 {offsets = [0, 32], sizes = [16, 16], strides = [1, 1]} : vector<16x56xf32> to vector<16x16xf32>
    %6 = vector.extract_strided_slice %3 {offsets = [0, 48], sizes = [16, 8], strides = [1, 1]} : vector<16x56xf32> to vector<16x8xf32>
    %7 = arith.truncf %4 : vector<16x32xf32> to vector<16x32xbf16>
    %c0_3 = arith.constant 0 : index
    %c0_4 = arith.constant 0 : index
    %8 = vector.load %arg3[%c0_3, %c0_4] : memref<32x64xbf16, #tpu.memory_space<vmem>>, vector<32x64xbf16>
    %cst_5 = arith.constant dense<0.000000e+00> : vector<16x64xf32>
    %9 = tpu.matmul %7, %8, %cst_5 {dimension_numbers = #tpu.dot_dimension_numbers<[1], [0], [0], [1], [0, 0, 1, 1], [], []>} : vector<16x32xbf16>, vector<32x64xbf16>, vector<16x64xf32> -> vector<16x64xf32>
    %10 = arith.truncf %5 : vector<16x16xf32> to vector<16x16xbf16>
    %c0_6 = arith.constant 0 : index
    %c0_7 = arith.constant 0 : index
    %11 = vector.load %arg4[%c0_6, %c0_7] : memref<16x64xbf16, #tpu.memory_space<vmem>>, vector<16x64xbf16>
    %cst_8 = arith.constant dense<0.000000e+00> : vector<16x64xf32>
    %12 = tpu.matmul %10, %11, %cst_8 {dimension_numbers = #tpu.dot_dimension_numbers<[1], [0], [0], [1], [0, 0, 1, 1], [], []>} : vector<16x16xbf16>, vector<16x64xbf16>, vector<16x64xf32> -> vector<16x64xf32>
    %13 = vector.extract_strided_slice %9 {offsets = [0, 0], sizes = [16, 32], strides = [1, 1]} : vector<16x64xf32> to vector<16x32xf32>
    %14 = vector.extract_strided_slice %9 {offsets = [0, 32], sizes = [16, 32], strides = [1, 1]} : vector<16x64xf32> to vector<16x32xf32>
    %15 = vector.extract_strided_slice %12 {offsets = [0, 0], sizes = [16, 32], strides = [1, 1]} : vector<16x64xf32> to vector<16x32xf32>
    %16 = vector.extract_strided_slice %12 {offsets = [0, 32], sizes = [16, 32], strides = [1, 1]} : vector<16x64xf32> to vector<16x32xf32>
    %c0_9 = arith.constant 0 : index
    %c0_10 = arith.constant 0 : index
    %17 = vector.load %arg6[%c0_9, %c0_10] : memref<8x16xf32, #tpu.memory_space<vmem>>, vector<8x16xf32>
    %c0_11 = arith.constant 0 : index
    %c0_12 = arith.constant 0 : index
    %18 = vector.load %arg7[%c0_11, %c0_12] : memref<8x16xf32, #tpu.memory_space<vmem>>, vector<8x16xf32>
    %19 = vector.extract_strided_slice %17 {offsets = [0, 0], sizes = [8, 4], strides = [1, 1]} : vector<8x16xf32> to vector<8x4xf32>
    %20 = vector.extract_strided_slice %18 {offsets = [0, 0], sizes = [8, 4], strides = [1, 1]} : vector<8x16xf32> to vector<8x4xf32>
    %21 = tpu.iota {dimensions = array<i32: 0>} : vector<8x8xi32>
    %22 = tpu.iota {dimensions = array<i32: 1>} : vector<8x8xi32>
    %23 = arith.cmpi sle, %22, %21 : vector<8x8xi32>
    %24 = vector.extract_strided_slice %14 {offsets = [0, 0], sizes = [8, 32], strides = [1, 1]} : vector<16x32xf32> to vector<8x32xf32>
    %25 = vector.extract_strided_slice %24 {offsets = [0, 0], sizes = [8, 16], strides = [1, 1]} : vector<8x32xf32> to vector<8x16xf32>
    %26 = vector.extract_strided_slice %24 {offsets = [0, 16], sizes = [8, 16], strides = [1, 1]} : vector<8x32xf32> to vector<8x16xf32>
    %27 = arith.mulf %25, %17 : vector<8x16xf32>
    %28 = arith.mulf %26, %18 : vector<8x16xf32>
    %29 = arith.subf %27, %28 : vector<8x16xf32>
    %30 = arith.mulf %25, %18 : vector<8x16xf32>
    %31 = arith.mulf %26, %17 : vector<8x16xf32>
    %32 = arith.addf %30, %31 : vector<8x16xf32>
    %33 = vector.extract_strided_slice %6 {offsets = [0, 0], sizes = [8, 8], strides = [1, 1]} : vector<16x8xf32> to vector<8x8xf32>
    %34 = vector.extract_strided_slice %33 {offsets = [0, 0], sizes = [8, 4], strides = [1, 1]} : vector<8x8xf32> to vector<8x4xf32>
    %35 = vector.extract_strided_slice %33 {offsets = [0, 4], sizes = [8, 4], strides = [1, 1]} : vector<8x8xf32> to vector<8x4xf32>
    %36 = arith.mulf %34, %19 : vector<8x4xf32>
    %37 = arith.mulf %35, %20 : vector<8x4xf32>
    %38 = arith.subf %36, %37 : vector<8x4xf32>
    %39 = arith.mulf %34, %20 : vector<8x4xf32>
    %40 = arith.mulf %35, %19 : vector<8x4xf32>
    %41 = arith.addf %39, %40 : vector<8x4xf32>
    %42 = tpu.concatenate %38, %41 in 1 : vector<8x4xf32>, vector<8x4xf32> -> vector<8x8xf32>
    %43 = vector.extract_strided_slice %13 {offsets = [0, 0], sizes = [8, 32], strides = [1, 1]} : vector<16x32xf32> to vector<8x32xf32>
    %44 = vector.extract_strided_slice %15 {offsets = [0, 0], sizes = [8, 32], strides = [1, 1]} : vector<16x32xf32> to vector<8x32xf32>
    %45 = vector.extract_strided_slice %16 {offsets = [0, 0], sizes = [8, 32], strides = [1, 1]} : vector<16x32xf32> to vector<8x32xf32>
    %46 = vector.extract_strided_slice %43 {offsets = [0, 0], sizes = [8, 8], strides = [1, 1]} : vector<8x32xf32> to vector<8x8xf32>
    %47 = vector.extract_strided_slice %29 {offsets = [0, 0], sizes = [8, 4], strides = [1, 1]} : vector<8x16xf32> to vector<8x4xf32>
    %48 = vector.extract_strided_slice %32 {offsets = [0, 0], sizes = [8, 4], strides = [1, 1]} : vector<8x16xf32> to vector<8x4xf32>
    %49 = tpu.concatenate %46, %47, %48 in 1 : vector<8x8xf32>, vector<8x4xf32>, vector<8x4xf32> -> vector<8x16xf32>
    %50 = vector.extract_strided_slice %44 {offsets = [0, 0], sizes = [8, 8], strides = [1, 1]} : vector<8x32xf32> to vector<8x8xf32>
    %51 = tpu.concatenate %50, %42 in 1 : vector<8x8xf32>, vector<8x8xf32> -> vector<8x16xf32>
    %52 = arith.truncf %49 : vector<8x16xf32> to vector<8x16xbf16>
    %53 = arith.truncf %51 : vector<8x16xf32> to vector<8x16xbf16>
    %cst_13 = arith.constant dense<0.000000e+00> : vector<8x8xf32>
    %54 = tpu.matmul %52, %53, %cst_13 {dimension_numbers = #tpu.dot_dimension_numbers<[1], [1], [0], [0], [0, 0, 1, 0], [], []>} : vector<8x16xbf16>, vector<8x16xbf16>, vector<8x8xf32> -> vector<8x8xf32>
    %cst_14 = arith.constant 0.288675129 : f32
    %55 = vector.broadcast %cst_14 : f32 to vector<8x8xf32>
    %56 = arith.mulf %54, %55 : vector<8x8xf32>
    %cst_15 = arith.constant -1.000000e+30 : f32
    %57 = vector.broadcast %cst_15 : f32 to vector<8x8xf32>
    %58 = arith.select %23, %56, %57 : vector<8x8xi1>, vector<8x8xf32>
    %cst_16 = arith.constant dense<0xFF800000> : vector<8xf32>
    %59 = vector.multi_reduction <maximumf>, %58, %cst_16 [1] : vector<8x8xf32> to vector<8xf32>
    %60 = vector.shape_cast %59 : vector<8xf32> to vector<8x1xf32>
    %61 = vector.broadcast %60 : vector<8x1xf32> to vector<8x8xf32>
    %62 = arith.subf %58, %61 : vector<8x8xf32>
    %63 = math.exp %62 : vector<8x8xf32>
    %cst_17 = arith.constant dense<0.000000e+00> : vector<8xf32>
    %64 = vector.multi_reduction <add>, %63, %cst_17 [1] : vector<8x8xf32> to vector<8xf32>
    %65 = vector.shape_cast %64 : vector<8xf32> to vector<8x1xf32>
    %66 = tpu.reciprocal %65 {approx = true} : vector<8x1xf32> -> vector<8x1xf32>
    %67 = arith.mulf %65, %66 : vector<8x1xf32>
    %cst_18 = arith.constant 2.000000e+00 : f32
    %68 = vector.broadcast %cst_18 : f32 to vector<8x1xf32>
    %69 = arith.subf %68, %67 : vector<8x1xf32>
    %70 = arith.mulf %66, %69 : vector<8x1xf32>
    %71 = arith.truncf %63 : vector<8x8xf32> to vector<8x8xbf16>
    %72 = vector.extract_strided_slice %45 {offsets = [0, 0], sizes = [8, 8], strides = [1, 1]} : vector<8x32xf32> to vector<8x8xf32>
    %73 = arith.truncf %72 : vector<8x8xf32> to vector<8x8xbf16>
    %cst_19 = arith.constant dense<0.000000e+00> : vector<8x8xf32>
    %74 = tpu.matmul %71, %73, %cst_19 {dimension_numbers = #tpu.dot_dimension_numbers<[1], [0], [0], [1], [0, 0, 1, 1], [], []>} : vector<8x8xbf16>, vector<8x8xbf16>, vector<8x8xf32> -> vector<8x8xf32>
    %75 = vector.broadcast %70 : vector<8x1xf32> to vector<8x8xf32>
    %76 = arith.mulf %74, %75 : vector<8x8xf32>
    %77 = vector.extract_strided_slice %43 {offsets = [0, 8], sizes = [8, 8], strides = [1, 1]} : vector<8x32xf32> to vector<8x8xf32>
    %78 = vector.extract_strided_slice %29 {offsets = [0, 4], sizes = [8, 4], strides = [1, 1]} : vector<8x16xf32> to vector<8x4xf32>
    %79 = vector.extract_strided_slice %32 {offsets = [0, 4], sizes = [8, 4], strides = [1, 1]} : vector<8x16xf32> to vector<8x4xf32>
    %80 = tpu.concatenate %77, %78, %79 in 1 : vector<8x8xf32>, vector<8x4xf32>, vector<8x4xf32> -> vector<8x16xf32>
    %81 = vector.extract_strided_slice %44 {offsets = [0, 8], sizes = [8, 8], strides = [1, 1]} : vector<8x32xf32> to vector<8x8xf32>
    %82 = tpu.concatenate %81, %42 in 1 : vector<8x8xf32>, vector<8x8xf32> -> vector<8x16xf32>
    %83 = arith.truncf %80 : vector<8x16xf32> to vector<8x16xbf16>
    %84 = arith.truncf %82 : vector<8x16xf32> to vector<8x16xbf16>
    %cst_20 = arith.constant dense<0.000000e+00> : vector<8x8xf32>
    %85 = tpu.matmul %83, %84, %cst_20 {dimension_numbers = #tpu.dot_dimension_numbers<[1], [1], [0], [0], [0, 0, 1, 0], [], []>} : vector<8x16xbf16>, vector<8x16xbf16>, vector<8x8xf32> -> vector<8x8xf32>
    %cst_21 = arith.constant 0.288675129 : f32
    %86 = vector.broadcast %cst_21 : f32 to vector<8x8xf32>
    %87 = arith.mulf %85, %86 : vector<8x8xf32>
    %cst_22 = arith.constant -1.000000e+30 : f32
    %88 = vector.broadcast %cst_22 : f32 to vector<8x8xf32>
    %89 = arith.select %23, %87, %88 : vector<8x8xi1>, vector<8x8xf32>
    %cst_23 = arith.constant dense<0xFF800000> : vector<8xf32>
    %90 = vector.multi_reduction <maximumf>, %89, %cst_23 [1] : vector<8x8xf32> to vector<8xf32>
    %91 = vector.shape_cast %90 : vector<8xf32> to vector<8x1xf32>
    %92 = vector.broadcast %91 : vector<8x1xf32> to vector<8x8xf32>
    %93 = arith.subf %89, %92 : vector<8x8xf32>
    %94 = math.exp %93 : vector<8x8xf32>
    %cst_24 = arith.constant dense<0.000000e+00> : vector<8xf32>
    %95 = vector.multi_reduction <add>, %94, %cst_24 [1] : vector<8x8xf32> to vector<8xf32>
    %96 = vector.shape_cast %95 : vector<8xf32> to vector<8x1xf32>
    %97 = tpu.reciprocal %96 {approx = true} : vector<8x1xf32> -> vector<8x1xf32>
    %98 = arith.mulf %96, %97 : vector<8x1xf32>
    %cst_25 = arith.constant 2.000000e+00 : f32
    %99 = vector.broadcast %cst_25 : f32 to vector<8x1xf32>
    %100 = arith.subf %99, %98 : vector<8x1xf32>
    %101 = arith.mulf %97, %100 : vector<8x1xf32>
    %102 = arith.truncf %94 : vector<8x8xf32> to vector<8x8xbf16>
    %103 = vector.extract_strided_slice %45 {offsets = [0, 8], sizes = [8, 8], strides = [1, 1]} : vector<8x32xf32> to vector<8x8xf32>
    %104 = arith.truncf %103 : vector<8x8xf32> to vector<8x8xbf16>
    %cst_26 = arith.constant dense<0.000000e+00> : vector<8x8xf32>
    %105 = tpu.matmul %102, %104, %cst_26 {dimension_numbers = #tpu.dot_dimension_numbers<[1], [0], [0], [1], [0, 0, 1, 1], [], []>} : vector<8x8xbf16>, vector<8x8xbf16>, vector<8x8xf32> -> vector<8x8xf32>
    %106 = vector.broadcast %101 : vector<8x1xf32> to vector<8x8xf32>
    %107 = arith.mulf %105, %106 : vector<8x8xf32>
    %108 = vector.extract_strided_slice %43 {offsets = [0, 16], sizes = [8, 8], strides = [1, 1]} : vector<8x32xf32> to vector<8x8xf32>
    %109 = vector.extract_strided_slice %29 {offsets = [0, 8], sizes = [8, 4], strides = [1, 1]} : vector<8x16xf32> to vector<8x4xf32>
    %110 = vector.extract_strided_slice %32 {offsets = [0, 8], sizes = [8, 4], strides = [1, 1]} : vector<8x16xf32> to vector<8x4xf32>
    %111 = tpu.concatenate %108, %109, %110 in 1 : vector<8x8xf32>, vector<8x4xf32>, vector<8x4xf32> -> vector<8x16xf32>
    %112 = vector.extract_strided_slice %44 {offsets = [0, 16], sizes = [8, 8], strides = [1, 1]} : vector<8x32xf32> to vector<8x8xf32>
    %113 = tpu.concatenate %112, %42 in 1 : vector<8x8xf32>, vector<8x8xf32> -> vector<8x16xf32>
    %114 = arith.truncf %111 : vector<8x16xf32> to vector<8x16xbf16>
    %115 = arith.truncf %113 : vector<8x16xf32> to vector<8x16xbf16>
    %cst_27 = arith.constant dense<0.000000e+00> : vector<8x8xf32>
    %116 = tpu.matmul %114, %115, %cst_27 {dimension_numbers = #tpu.dot_dimension_numbers<[1], [1], [0], [0], [0, 0, 1, 0], [], []>} : vector<8x16xbf16>, vector<8x16xbf16>, vector<8x8xf32> -> vector<8x8xf32>
    %cst_28 = arith.constant 0.288675129 : f32
    %117 = vector.broadcast %cst_28 : f32 to vector<8x8xf32>
    %118 = arith.mulf %116, %117 : vector<8x8xf32>
    %cst_29 = arith.constant -1.000000e+30 : f32
    %119 = vector.broadcast %cst_29 : f32 to vector<8x8xf32>
    %120 = arith.select %23, %118, %119 : vector<8x8xi1>, vector<8x8xf32>
    %cst_30 = arith.constant dense<0xFF800000> : vector<8xf32>
    %121 = vector.multi_reduction <maximumf>, %120, %cst_30 [1] : vector<8x8xf32> to vector<8xf32>
    %122 = vector.shape_cast %121 : vector<8xf32> to vector<8x1xf32>
    %123 = vector.broadcast %122 : vector<8x1xf32> to vector<8x8xf32>
    %124 = arith.subf %120, %123 : vector<8x8xf32>
    %125 = math.exp %124 : vector<8x8xf32>
    %cst_31 = arith.constant dense<0.000000e+00> : vector<8xf32>
    %126 = vector.multi_reduction <add>, %125, %cst_31 [1] : vector<8x8xf32> to vector<8xf32>
    %127 = vector.shape_cast %126 : vector<8xf32> to vector<8x1xf32>
    %128 = tpu.reciprocal %127 {approx = true} : vector<8x1xf32> -> vector<8x1xf32>
    %129 = arith.mulf %127, %128 : vector<8x1xf32>
    %cst_32 = arith.constant 2.000000e+00 : f32
    %130 = vector.broadcast %cst_32 : f32 to vector<8x1xf32>
    %131 = arith.subf %130, %129 : vector<8x1xf32>
    %132 = arith.mulf %128, %131 : vector<8x1xf32>
    %133 = arith.truncf %125 : vector<8x8xf32> to vector<8x8xbf16>
    %134 = vector.extract_strided_slice %45 {offsets = [0, 16], sizes = [8, 8], strides = [1, 1]} : vector<8x32xf32> to vector<8x8xf32>
    %135 = arith.truncf %134 : vector<8x8xf32> to vector<8x8xbf16>
    %cst_33 = arith.constant dense<0.000000e+00> : vector<8x8xf32>
    %136 = tpu.matmul %133, %135, %cst_33 {dimension_numbers = #tpu.dot_dimension_numbers<[1], [0], [0], [1], [0, 0, 1, 1], [], []>} : vector<8x8xbf16>, vector<8x8xbf16>, vector<8x8xf32> -> vector<8x8xf32>
    %137 = vector.broadcast %132 : vector<8x1xf32> to vector<8x8xf32>
    %138 = arith.mulf %136, %137 : vector<8x8xf32>
    %139 = vector.extract_strided_slice %43 {offsets = [0, 24], sizes = [8, 8], strides = [1, 1]} : vector<8x32xf32> to vector<8x8xf32>
    %140 = vector.extract_strided_slice %29 {offsets = [0, 12], sizes = [8, 4], strides = [1, 1]} : vector<8x16xf32> to vector<8x4xf32>
    %141 = vector.extract_strided_slice %32 {offsets = [0, 12], sizes = [8, 4], strides = [1, 1]} : vector<8x16xf32> to vector<8x4xf32>
    %142 = tpu.concatenate %139, %140, %141 in 1 : vector<8x8xf32>, vector<8x4xf32>, vector<8x4xf32> -> vector<8x16xf32>
    %143 = vector.extract_strided_slice %44 {offsets = [0, 24], sizes = [8, 8], strides = [1, 1]} : vector<8x32xf32> to vector<8x8xf32>
    %144 = tpu.concatenate %143, %42 in 1 : vector<8x8xf32>, vector<8x8xf32> -> vector<8x16xf32>
    %145 = arith.truncf %142 : vector<8x16xf32> to vector<8x16xbf16>
    %146 = arith.truncf %144 : vector<8x16xf32> to vector<8x16xbf16>
    %cst_34 = arith.constant dense<0.000000e+00> : vector<8x8xf32>
    %147 = tpu.matmul %145, %146, %cst_34 {dimension_numbers = #tpu.dot_dimension_numbers<[1], [1], [0], [0], [0, 0, 1, 0], [], []>} : vector<8x16xbf16>, vector<8x16xbf16>, vector<8x8xf32> -> vector<8x8xf32>
    %cst_35 = arith.constant 0.288675129 : f32
    %148 = vector.broadcast %cst_35 : f32 to vector<8x8xf32>
    %149 = arith.mulf %147, %148 : vector<8x8xf32>
    %cst_36 = arith.constant -1.000000e+30 : f32
    %150 = vector.broadcast %cst_36 : f32 to vector<8x8xf32>
    %151 = arith.select %23, %149, %150 : vector<8x8xi1>, vector<8x8xf32>
    %cst_37 = arith.constant dense<0xFF800000> : vector<8xf32>
    %152 = vector.multi_reduction <maximumf>, %151, %cst_37 [1] : vector<8x8xf32> to vector<8xf32>
    %153 = vector.shape_cast %152 : vector<8xf32> to vector<8x1xf32>
    %154 = vector.broadcast %153 : vector<8x1xf32> to vector<8x8xf32>
    %155 = arith.subf %151, %154 : vector<8x8xf32>
    %156 = math.exp %155 : vector<8x8xf32>
    %cst_38 = arith.constant dense<0.000000e+00> : vector<8xf32>
    %157 = vector.multi_reduction <add>, %156, %cst_38 [1] : vector<8x8xf32> to vector<8xf32>
    %158 = vector.shape_cast %157 : vector<8xf32> to vector<8x1xf32>
    %159 = tpu.reciprocal %158 {approx = true} : vector<8x1xf32> -> vector<8x1xf32>
    %160 = arith.mulf %158, %159 : vector<8x1xf32>
    %cst_39 = arith.constant 2.000000e+00 : f32
    %161 = vector.broadcast %cst_39 : f32 to vector<8x1xf32>
    %162 = arith.subf %161, %160 : vector<8x1xf32>
    %163 = arith.mulf %159, %162 : vector<8x1xf32>
    %164 = arith.truncf %156 : vector<8x8xf32> to vector<8x8xbf16>
    %165 = vector.extract_strided_slice %45 {offsets = [0, 24], sizes = [8, 8], strides = [1, 1]} : vector<8x32xf32> to vector<8x8xf32>
    %166 = arith.truncf %165 : vector<8x8xf32> to vector<8x8xbf16>
    %cst_40 = arith.constant dense<0.000000e+00> : vector<8x8xf32>
    %167 = tpu.matmul %164, %166, %cst_40 {dimension_numbers = #tpu.dot_dimension_numbers<[1], [0], [0], [1], [0, 0, 1, 1], [], []>} : vector<8x8xbf16>, vector<8x8xbf16>, vector<8x8xf32> -> vector<8x8xf32>
    %168 = vector.broadcast %163 : vector<8x1xf32> to vector<8x8xf32>
    %169 = arith.mulf %167, %168 : vector<8x8xf32>
    %170 = tpu.concatenate %76, %107, %138, %169 in 1 : vector<8x8xf32>, vector<8x8xf32>, vector<8x8xf32>, vector<8x8xf32> -> vector<8x32xf32>
    %171 = vector.extract_strided_slice %14 {offsets = [8, 0], sizes = [8, 32], strides = [1, 1]} : vector<16x32xf32> to vector<8x32xf32>
    %172 = vector.extract_strided_slice %171 {offsets = [0, 0], sizes = [8, 16], strides = [1, 1]} : vector<8x32xf32> to vector<8x16xf32>
    %173 = vector.extract_strided_slice %171 {offsets = [0, 16], sizes = [8, 16], strides = [1, 1]} : vector<8x32xf32> to vector<8x16xf32>
    %174 = arith.mulf %172, %17 : vector<8x16xf32>
    %175 = arith.mulf %173, %18 : vector<8x16xf32>
    %176 = arith.subf %174, %175 : vector<8x16xf32>
    %177 = arith.mulf %172, %18 : vector<8x16xf32>
    %178 = arith.mulf %173, %17 : vector<8x16xf32>
    %179 = arith.addf %177, %178 : vector<8x16xf32>
    %180 = vector.extract_strided_slice %6 {offsets = [8, 0], sizes = [8, 8], strides = [1, 1]} : vector<16x8xf32> to vector<8x8xf32>
    %181 = vector.extract_strided_slice %180 {offsets = [0, 0], sizes = [8, 4], strides = [1, 1]} : vector<8x8xf32> to vector<8x4xf32>
    %182 = vector.extract_strided_slice %180 {offsets = [0, 4], sizes = [8, 4], strides = [1, 1]} : vector<8x8xf32> to vector<8x4xf32>
    %183 = arith.mulf %181, %19 : vector<8x4xf32>
    %184 = arith.mulf %182, %20 : vector<8x4xf32>
    %185 = arith.subf %183, %184 : vector<8x4xf32>
    %186 = arith.mulf %181, %20 : vector<8x4xf32>
    %187 = arith.mulf %182, %19 : vector<8x4xf32>
    %188 = arith.addf %186, %187 : vector<8x4xf32>
    %189 = tpu.concatenate %185, %188 in 1 : vector<8x4xf32>, vector<8x4xf32> -> vector<8x8xf32>
    %190 = vector.extract_strided_slice %13 {offsets = [8, 0], sizes = [8, 32], strides = [1, 1]} : vector<16x32xf32> to vector<8x32xf32>
    %191 = vector.extract_strided_slice %15 {offsets = [8, 0], sizes = [8, 32], strides = [1, 1]} : vector<16x32xf32> to vector<8x32xf32>
    %192 = vector.extract_strided_slice %16 {offsets = [8, 0], sizes = [8, 32], strides = [1, 1]} : vector<16x32xf32> to vector<8x32xf32>
    %193 = vector.extract_strided_slice %190 {offsets = [0, 0], sizes = [8, 8], strides = [1, 1]} : vector<8x32xf32> to vector<8x8xf32>
    %194 = vector.extract_strided_slice %176 {offsets = [0, 0], sizes = [8, 4], strides = [1, 1]} : vector<8x16xf32> to vector<8x4xf32>
    %195 = vector.extract_strided_slice %179 {offsets = [0, 0], sizes = [8, 4], strides = [1, 1]} : vector<8x16xf32> to vector<8x4xf32>
    %196 = tpu.concatenate %193, %194, %195 in 1 : vector<8x8xf32>, vector<8x4xf32>, vector<8x4xf32> -> vector<8x16xf32>
    %197 = vector.extract_strided_slice %191 {offsets = [0, 0], sizes = [8, 8], strides = [1, 1]} : vector<8x32xf32> to vector<8x8xf32>
    %198 = tpu.concatenate %197, %189 in 1 : vector<8x8xf32>, vector<8x8xf32> -> vector<8x16xf32>
    %199 = arith.truncf %196 : vector<8x16xf32> to vector<8x16xbf16>
    %200 = arith.truncf %198 : vector<8x16xf32> to vector<8x16xbf16>
    %cst_41 = arith.constant dense<0.000000e+00> : vector<8x8xf32>
    %201 = tpu.matmul %199, %200, %cst_41 {dimension_numbers = #tpu.dot_dimension_numbers<[1], [1], [0], [0], [0, 0, 1, 0], [], []>} : vector<8x16xbf16>, vector<8x16xbf16>, vector<8x8xf32> -> vector<8x8xf32>
    %cst_42 = arith.constant 0.288675129 : f32
    %202 = vector.broadcast %cst_42 : f32 to vector<8x8xf32>
    %203 = arith.mulf %201, %202 : vector<8x8xf32>
    %cst_43 = arith.constant -1.000000e+30 : f32
    %204 = vector.broadcast %cst_43 : f32 to vector<8x8xf32>
    %205 = arith.select %23, %203, %204 : vector<8x8xi1>, vector<8x8xf32>
    %cst_44 = arith.constant dense<0xFF800000> : vector<8xf32>
    %206 = vector.multi_reduction <maximumf>, %205, %cst_44 [1] : vector<8x8xf32> to vector<8xf32>
    %207 = vector.shape_cast %206 : vector<8xf32> to vector<8x1xf32>
    %208 = vector.broadcast %207 : vector<8x1xf32> to vector<8x8xf32>
    %209 = arith.subf %205, %208 : vector<8x8xf32>
    %210 = math.exp %209 : vector<8x8xf32>
    %cst_45 = arith.constant dense<0.000000e+00> : vector<8xf32>
    %211 = vector.multi_reduction <add>, %210, %cst_45 [1] : vector<8x8xf32> to vector<8xf32>
    %212 = vector.shape_cast %211 : vector<8xf32> to vector<8x1xf32>
    %213 = tpu.reciprocal %212 {approx = true} : vector<8x1xf32> -> vector<8x1xf32>
    %214 = arith.mulf %212, %213 : vector<8x1xf32>
    %cst_46 = arith.constant 2.000000e+00 : f32
    %215 = vector.broadcast %cst_46 : f32 to vector<8x1xf32>
    %216 = arith.subf %215, %214 : vector<8x1xf32>
    %217 = arith.mulf %213, %216 : vector<8x1xf32>
    %218 = arith.truncf %210 : vector<8x8xf32> to vector<8x8xbf16>
    %219 = vector.extract_strided_slice %192 {offsets = [0, 0], sizes = [8, 8], strides = [1, 1]} : vector<8x32xf32> to vector<8x8xf32>
    %220 = arith.truncf %219 : vector<8x8xf32> to vector<8x8xbf16>
    %cst_47 = arith.constant dense<0.000000e+00> : vector<8x8xf32>
    %221 = tpu.matmul %218, %220, %cst_47 {dimension_numbers = #tpu.dot_dimension_numbers<[1], [0], [0], [1], [0, 0, 1, 1], [], []>} : vector<8x8xbf16>, vector<8x8xbf16>, vector<8x8xf32> -> vector<8x8xf32>
    %222 = vector.broadcast %217 : vector<8x1xf32> to vector<8x8xf32>
    %223 = arith.mulf %221, %222 : vector<8x8xf32>
    %224 = vector.extract_strided_slice %190 {offsets = [0, 8], sizes = [8, 8], strides = [1, 1]} : vector<8x32xf32> to vector<8x8xf32>
    %225 = vector.extract_strided_slice %176 {offsets = [0, 4], sizes = [8, 4], strides = [1, 1]} : vector<8x16xf32> to vector<8x4xf32>
    %226 = vector.extract_strided_slice %179 {offsets = [0, 4], sizes = [8, 4], strides = [1, 1]} : vector<8x16xf32> to vector<8x4xf32>
    %227 = tpu.concatenate %224, %225, %226 in 1 : vector<8x8xf32>, vector<8x4xf32>, vector<8x4xf32> -> vector<8x16xf32>
    %228 = vector.extract_strided_slice %191 {offsets = [0, 8], sizes = [8, 8], strides = [1, 1]} : vector<8x32xf32> to vector<8x8xf32>
    %229 = tpu.concatenate %228, %189 in 1 : vector<8x8xf32>, vector<8x8xf32> -> vector<8x16xf32>
    %230 = arith.truncf %227 : vector<8x16xf32> to vector<8x16xbf16>
    %231 = arith.truncf %229 : vector<8x16xf32> to vector<8x16xbf16>
    %cst_48 = arith.constant dense<0.000000e+00> : vector<8x8xf32>
    %232 = tpu.matmul %230, %231, %cst_48 {dimension_numbers = #tpu.dot_dimension_numbers<[1], [1], [0], [0], [0, 0, 1, 0], [], []>} : vector<8x16xbf16>, vector<8x16xbf16>, vector<8x8xf32> -> vector<8x8xf32>
    %cst_49 = arith.constant 0.288675129 : f32
    %233 = vector.broadcast %cst_49 : f32 to vector<8x8xf32>
    %234 = arith.mulf %232, %233 : vector<8x8xf32>
    %cst_50 = arith.constant -1.000000e+30 : f32
    %235 = vector.broadcast %cst_50 : f32 to vector<8x8xf32>
    %236 = arith.select %23, %234, %235 : vector<8x8xi1>, vector<8x8xf32>
    %cst_51 = arith.constant dense<0xFF800000> : vector<8xf32>
    %237 = vector.multi_reduction <maximumf>, %236, %cst_51 [1] : vector<8x8xf32> to vector<8xf32>
    %238 = vector.shape_cast %237 : vector<8xf32> to vector<8x1xf32>
    %239 = vector.broadcast %238 : vector<8x1xf32> to vector<8x8xf32>
    %240 = arith.subf %236, %239 : vector<8x8xf32>
    %241 = math.exp %240 : vector<8x8xf32>
    %cst_52 = arith.constant dense<0.000000e+00> : vector<8xf32>
    %242 = vector.multi_reduction <add>, %241, %cst_52 [1] : vector<8x8xf32> to vector<8xf32>
    %243 = vector.shape_cast %242 : vector<8xf32> to vector<8x1xf32>
    %244 = tpu.reciprocal %243 {approx = true} : vector<8x1xf32> -> vector<8x1xf32>
    %245 = arith.mulf %243, %244 : vector<8x1xf32>
    %cst_53 = arith.constant 2.000000e+00 : f32
    %246 = vector.broadcast %cst_53 : f32 to vector<8x1xf32>
    %247 = arith.subf %246, %245 : vector<8x1xf32>
    %248 = arith.mulf %244, %247 : vector<8x1xf32>
    %249 = arith.truncf %241 : vector<8x8xf32> to vector<8x8xbf16>
    %250 = vector.extract_strided_slice %192 {offsets = [0, 8], sizes = [8, 8], strides = [1, 1]} : vector<8x32xf32> to vector<8x8xf32>
    %251 = arith.truncf %250 : vector<8x8xf32> to vector<8x8xbf16>
    %cst_54 = arith.constant dense<0.000000e+00> : vector<8x8xf32>
    %252 = tpu.matmul %249, %251, %cst_54 {dimension_numbers = #tpu.dot_dimension_numbers<[1], [0], [0], [1], [0, 0, 1, 1], [], []>} : vector<8x8xbf16>, vector<8x8xbf16>, vector<8x8xf32> -> vector<8x8xf32>
    %253 = vector.broadcast %248 : vector<8x1xf32> to vector<8x8xf32>
    %254 = arith.mulf %252, %253 : vector<8x8xf32>
    %255 = vector.extract_strided_slice %190 {offsets = [0, 16], sizes = [8, 8], strides = [1, 1]} : vector<8x32xf32> to vector<8x8xf32>
    %256 = vector.extract_strided_slice %176 {offsets = [0, 8], sizes = [8, 4], strides = [1, 1]} : vector<8x16xf32> to vector<8x4xf32>
    %257 = vector.extract_strided_slice %179 {offsets = [0, 8], sizes = [8, 4], strides = [1, 1]} : vector<8x16xf32> to vector<8x4xf32>
    %258 = tpu.concatenate %255, %256, %257 in 1 : vector<8x8xf32>, vector<8x4xf32>, vector<8x4xf32> -> vector<8x16xf32>
    %259 = vector.extract_strided_slice %191 {offsets = [0, 16], sizes = [8, 8], strides = [1, 1]} : vector<8x32xf32> to vector<8x8xf32>
    %260 = tpu.concatenate %259, %189 in 1 : vector<8x8xf32>, vector<8x8xf32> -> vector<8x16xf32>
    %261 = arith.truncf %258 : vector<8x16xf32> to vector<8x16xbf16>
    %262 = arith.truncf %260 : vector<8x16xf32> to vector<8x16xbf16>
    %cst_55 = arith.constant dense<0.000000e+00> : vector<8x8xf32>
    %263 = tpu.matmul %261, %262, %cst_55 {dimension_numbers = #tpu.dot_dimension_numbers<[1], [1], [0], [0], [0, 0, 1, 0], [], []>} : vector<8x16xbf16>, vector<8x16xbf16>, vector<8x8xf32> -> vector<8x8xf32>
    %cst_56 = arith.constant 0.288675129 : f32
    %264 = vector.broadcast %cst_56 : f32 to vector<8x8xf32>
    %265 = arith.mulf %263, %264 : vector<8x8xf32>
    %cst_57 = arith.constant -1.000000e+30 : f32
    %266 = vector.broadcast %cst_57 : f32 to vector<8x8xf32>
    %267 = arith.select %23, %265, %266 : vector<8x8xi1>, vector<8x8xf32>
    %cst_58 = arith.constant dense<0xFF800000> : vector<8xf32>
    %268 = vector.multi_reduction <maximumf>, %267, %cst_58 [1] : vector<8x8xf32> to vector<8xf32>
    %269 = vector.shape_cast %268 : vector<8xf32> to vector<8x1xf32>
    %270 = vector.broadcast %269 : vector<8x1xf32> to vector<8x8xf32>
    %271 = arith.subf %267, %270 : vector<8x8xf32>
    %272 = math.exp %271 : vector<8x8xf32>
    %cst_59 = arith.constant dense<0.000000e+00> : vector<8xf32>
    %273 = vector.multi_reduction <add>, %272, %cst_59 [1] : vector<8x8xf32> to vector<8xf32>
    %274 = vector.shape_cast %273 : vector<8xf32> to vector<8x1xf32>
    %275 = tpu.reciprocal %274 {approx = true} : vector<8x1xf32> -> vector<8x1xf32>
    %276 = arith.mulf %274, %275 : vector<8x1xf32>
    %cst_60 = arith.constant 2.000000e+00 : f32
    %277 = vector.broadcast %cst_60 : f32 to vector<8x1xf32>
    %278 = arith.subf %277, %276 : vector<8x1xf32>
    %279 = arith.mulf %275, %278 : vector<8x1xf32>
    %280 = arith.truncf %272 : vector<8x8xf32> to vector<8x8xbf16>
    %281 = vector.extract_strided_slice %192 {offsets = [0, 16], sizes = [8, 8], strides = [1, 1]} : vector<8x32xf32> to vector<8x8xf32>
    %282 = arith.truncf %281 : vector<8x8xf32> to vector<8x8xbf16>
    %cst_61 = arith.constant dense<0.000000e+00> : vector<8x8xf32>
    %283 = tpu.matmul %280, %282, %cst_61 {dimension_numbers = #tpu.dot_dimension_numbers<[1], [0], [0], [1], [0, 0, 1, 1], [], []>} : vector<8x8xbf16>, vector<8x8xbf16>, vector<8x8xf32> -> vector<8x8xf32>
    %284 = vector.broadcast %279 : vector<8x1xf32> to vector<8x8xf32>
    %285 = arith.mulf %283, %284 : vector<8x8xf32>
    %286 = vector.extract_strided_slice %190 {offsets = [0, 24], sizes = [8, 8], strides = [1, 1]} : vector<8x32xf32> to vector<8x8xf32>
    %287 = vector.extract_strided_slice %176 {offsets = [0, 12], sizes = [8, 4], strides = [1, 1]} : vector<8x16xf32> to vector<8x4xf32>
    %288 = vector.extract_strided_slice %179 {offsets = [0, 12], sizes = [8, 4], strides = [1, 1]} : vector<8x16xf32> to vector<8x4xf32>
    %289 = tpu.concatenate %286, %287, %288 in 1 : vector<8x8xf32>, vector<8x4xf32>, vector<8x4xf32> -> vector<8x16xf32>
    %290 = vector.extract_strided_slice %191 {offsets = [0, 24], sizes = [8, 8], strides = [1, 1]} : vector<8x32xf32> to vector<8x8xf32>
    %291 = tpu.concatenate %290, %189 in 1 : vector<8x8xf32>, vector<8x8xf32> -> vector<8x16xf32>
    %292 = arith.truncf %289 : vector<8x16xf32> to vector<8x16xbf16>
    %293 = arith.truncf %291 : vector<8x16xf32> to vector<8x16xbf16>
    %cst_62 = arith.constant dense<0.000000e+00> : vector<8x8xf32>
    %294 = tpu.matmul %292, %293, %cst_62 {dimension_numbers = #tpu.dot_dimension_numbers<[1], [1], [0], [0], [0, 0, 1, 0], [], []>} : vector<8x16xbf16>, vector<8x16xbf16>, vector<8x8xf32> -> vector<8x8xf32>
    %cst_63 = arith.constant 0.288675129 : f32
    %295 = vector.broadcast %cst_63 : f32 to vector<8x8xf32>
    %296 = arith.mulf %294, %295 : vector<8x8xf32>
    %cst_64 = arith.constant -1.000000e+30 : f32
    %297 = vector.broadcast %cst_64 : f32 to vector<8x8xf32>
    %298 = arith.select %23, %296, %297 : vector<8x8xi1>, vector<8x8xf32>
    %cst_65 = arith.constant dense<0xFF800000> : vector<8xf32>
    %299 = vector.multi_reduction <maximumf>, %298, %cst_65 [1] : vector<8x8xf32> to vector<8xf32>
    %300 = vector.shape_cast %299 : vector<8xf32> to vector<8x1xf32>
    %301 = vector.broadcast %300 : vector<8x1xf32> to vector<8x8xf32>
    %302 = arith.subf %298, %301 : vector<8x8xf32>
    %303 = math.exp %302 : vector<8x8xf32>
    %cst_66 = arith.constant dense<0.000000e+00> : vector<8xf32>
    %304 = vector.multi_reduction <add>, %303, %cst_66 [1] : vector<8x8xf32> to vector<8xf32>
    %305 = vector.shape_cast %304 : vector<8xf32> to vector<8x1xf32>
    %306 = tpu.reciprocal %305 {approx = true} : vector<8x1xf32> -> vector<8x1xf32>
    %307 = arith.mulf %305, %306 : vector<8x1xf32>
    %cst_67 = arith.constant 2.000000e+00 : f32
    %308 = vector.broadcast %cst_67 : f32 to vector<8x1xf32>
    %309 = arith.subf %308, %307 : vector<8x1xf32>
    %310 = arith.mulf %306, %309 : vector<8x1xf32>
    %311 = arith.truncf %303 : vector<8x8xf32> to vector<8x8xbf16>
    %312 = vector.extract_strided_slice %192 {offsets = [0, 24], sizes = [8, 8], strides = [1, 1]} : vector<8x32xf32> to vector<8x8xf32>
    %313 = arith.truncf %312 : vector<8x8xf32> to vector<8x8xbf16>
    %cst_68 = arith.constant dense<0.000000e+00> : vector<8x8xf32>
    %314 = tpu.matmul %311, %313, %cst_68 {dimension_numbers = #tpu.dot_dimension_numbers<[1], [0], [0], [1], [0, 0, 1, 1], [], []>} : vector<8x8xbf16>, vector<8x8xbf16>, vector<8x8xf32> -> vector<8x8xf32>
    %315 = vector.broadcast %310 : vector<8x1xf32> to vector<8x8xf32>
    %316 = arith.mulf %314, %315 : vector<8x8xf32>
    %317 = tpu.concatenate %223, %254, %285, %316 in 1 : vector<8x8xf32>, vector<8x8xf32>, vector<8x8xf32>, vector<8x8xf32> -> vector<8x32xf32>
    %318 = tpu.concatenate %170, %317 in 0 : vector<8x32xf32>, vector<8x32xf32> -> vector<16x32xf32>
    %319 = arith.truncf %318 : vector<16x32xf32> to vector<16x32xbf16>
    %c0_69 = arith.constant 0 : index
    %c0_70 = arith.constant 0 : index
    %320 = vector.load %arg5[%c0_69, %c0_70] : memref<32x32xbf16, #tpu.memory_space<vmem>>, vector<32x32xbf16>
    %cst_71 = arith.constant dense<0.000000e+00> : vector<16x32xf32>
    %321 = tpu.matmul %319, %320, %cst_71 {dimension_numbers = #tpu.dot_dimension_numbers<[1], [0], [0], [1], [0, 0, 1, 1], [], []>} : vector<16x32xbf16>, vector<32x32xbf16>, vector<16x32xf32> -> vector<16x32xf32>
    %c0_72 = arith.constant 0 : index
    %c0_73 = arith.constant 0 : index
    %322 = vector.load %arg8[%c0_72, %c0_73] : memref<16x32xf32, #tpu.memory_space<vmem>>, vector<16x32xf32>
    tpu.vector_store %arg8[%c0_72, %c0_73], %321 {strides = array<i32>} : memref<16x32xf32, #tpu.memory_space<vmem>>, vector<16x32xf32>,
    return
  }
  func.func @transform_0(%arg0: i32) -> (i32, i32) {
    %c0_i32 = arith.constant 0 : i32
    %c0_i32_0 = arith.constant 0 : i32
    %c0_i32_1 = arith.constant 0 : i32
    return %c0_i32, %c0_i32_0 : i32, i32
  }
  func.func @transform_1(%arg0: i32) -> (i32, i32) {
    %c0_i32 = arith.constant 0 : i32
    %c0_i32_0 = arith.constant 0 : i32
    %c0_i32_1 = arith.constant 0 : i32
    return %c0_i32, %c0_i32_0 : i32, i32
  }
  func.func @transform_2(%arg0: i32) -> (i32, i32) {
    %c0_i32 = arith.constant 0 : i32
    %c0_i32_0 = arith.constant 0 : i32
    %c0_i32_1 = arith.constant 0 : i32
    return %c0_i32, %c0_i32_0 : i32, i32
  }
  func.func @transform_3(%arg0: i32) -> (i32, i32) {
    %c0_i32 = arith.constant 0 : i32
    %c0_i32_0 = arith.constant 0 : i32
    %c0_i32_1 = arith.constant 0 : i32
    return %c0_i32, %c0_i32_0 : i32, i32
  }
  func.func @transform_4(%arg0: i32) -> (i32, i32) {
    %c0_i32 = arith.constant 0 : i32
    %c0_i32_0 = arith.constant 0 : i32
    %c0_i32_1 = arith.constant 0 : i32
    return %c0_i32, %c0_i32_0 : i32, i32
  }
  func.func @transform_5(%arg0: i32) -> (i32, i32) {
    %c0_i32 = arith.constant 0 : i32
    %c0_i32_0 = arith.constant 0 : i32
    %c0_i32_1 = arith.constant 0 : i32
    return %c0_i32, %c0_i32_0 : i32, i32
  }
  func.func @transform_6(%arg0: i32) -> (i32, i32) {
    %c0_i32 = arith.constant 0 : i32
    %c0_i32_0 = arith.constant 0 : i32
    %c0_i32_1 = arith.constant 0 : i32
    return %c0_i32, %c0_i32_0 : i32, i32
  }
  func.func @transform_7(%arg0: i32) -> (i32, i32) {
    %c0_i32 = arith.constant 0 : i32
    %c0_i32_0 = arith.constant 0 : i32
    %c0_i32_1 = arith.constant 0 : i32
    return %c0_i32, %c0_i32_0 : i32, i32
  }
}

</mosaic_0001>

<bundles_post_ra>
// kernel: mla_forward.1
= control target key start
LH: loop header
LB: loop body
LE: loop exit
PB: predicated region body
PF: predicated region fallthrough
CT: control target
= control target key end

     0   :  { %12 = vsyncpa [#allocation3], 0  ;;  %s2422_s0 = inlined_call_operand.vmem [shape: f32[16,32], index: 0, kind: input, shape index: {}]   ;;  %s2423_s1 = inlined_call_operand.hbm [shape: bf16[32,56], index: 1, kind: input, shape index: {}]   ;;  %s2424_s2 = inlined_call_operand.hbm [shape: bf16[32,64], index: 2, kind: input, shape index: {}]   ;;  %s2425_s3 = inlined_call_operand.hbm [shape: bf16[16,64], index: 3, kind: input, shape index: {}]   ;;  %s2426_s4 = inlined_call_operand.hbm [shape: bf16[32,32], index: 4, kind: input, shape index: {}]   ;;  %s2427_s5 = inlined_call_operand.hbm [shape: f32[8,16], index: 5, kind: input, shape index: {}]   ;;  %s2428_s6 = inlined_call_operand.vmem [shape: f32[8,16], index: 6, kind: input, shape index: {}]   ;;  %s2429_s7 = inlined_call_operand.hbm [shape: f32[16,32], index: 7, kind: output, shape index: {}]  }
   0x1   :  { %13 = vsyncpa [#allocation6], 0 }
   0x2   :  { %14 = vsyncpa [#allocation9], 0 }
   0x3   :  { %15 = vsyncpa [#allocation4], 0  ;;  %s1944_s24 = smov [#allocation5]   ;;  %s1945_s26 = smov [#allocation8]  }
   0x4   :  { %s35_s25 = sshll.u32 %s1944_s24, 4  ;;  %s59_s27 = sshll.u32 %s1945_s26, 4  ;;  %s36_s25 = int_to_ptr.vmem [resolvable:$true] %s35_s25  ;;  %s2013_s27 = int_to_ptr.vmem [resolvable:$true] %s59_s27 }
   0x5   :  { %s1804_s30 = scalar_lea.hbm %s2424_s2, 256 }
   0x6   :  { %p1805_p0 = scmp.ne.s32.totalorder %s2424_s2, %s1804_s30  ;;  %p1808_p1 = scmp.lt.u32.totalorder %s1804_s30, %s2424_s2 }
   0x8   :  { %p1810_p2 = pnand %p1808_p1, %p1805_p0 }
   0xa   :  { %1813 = shalt.err (!%p1810_p2)
}
   0xb   :  { %s1814_s12 = scalar_lea.vmem %s36_s25, 256  ;;  %p1819_p4 = scmp.lt.s32.totalorder %s36_s25, %s36_s25 }
   0xc   :  { %p1815_p3 = scmp.ne.s32.totalorder %s36_s25, %s1814_s12  ;;  %p1820_p5 = scmp.lt.s32.totalorder %s1814_s12, %s1814_s12 }
   0xe   :  { %p1821_p6 = por %p1820_p5, %p1819_p4 }
  0x10   :  { %p1822_p7 = pnand %p1821_p6, %p1815_p3 }
  0x12   :  { %1825 = shalt.err (!%p1822_p7)
}
  0x13   :  { %s1946_s13 = smov 64   ;;  %s1947_s14 = smov 4  }
  0x14   :  { %41 = dma.hbm_to_vmem [thread:$0]  %s2424_s2, 256, %s36_s25, [#allocation6], %s1946_s13, %s1946_s13, %s1947_s14  }
  0x15   :  { %s1826_s19 = scalar_lea.hbm %s2426_s4, 256 }
  0x16   :  { %p1827_p8 = scmp.ne.s32.totalorder %s2426_s4, %s1826_s19  ;;  %p1830_p9 = scmp.lt.u32.totalorder %s1826_s19, %s2426_s4 }
  0x18   :  { %p1832_p10 = pnand %p1830_p9, %p1827_p8 }
  0x1a   :  { %1835 = shalt.err (!%p1832_p10)
}
  0x1b   :  { %s1836_s24 = scalar_lea.vmem %s2013_s27, 256  ;;  %p1841_p12 = scmp.lt.s32.totalorder %s2013_s27, %s2013_s27 }
  0x1c   :  { %p1837_p11 = scmp.ne.s32.totalorder %s2013_s27, %s1836_s24  ;;  %p1842_p13 = scmp.lt.s32.totalorder %s1836_s24, %s1836_s24 }
  0x1e   :  { %p1843_p0 = por %p1842_p13, %p1841_p12 }
  0x20   :  { %p1844_p1 = pnand %p1843_p0, %p1837_p11 }
  0x22   :  { %1847 = shalt.err (!%p1844_p1)
}
  0x23   :  { %65 = dma.hbm_to_vmem [thread:$0]  %s2426_s4, 256, %s2013_s27, [#allocation9], %s1946_s13, %s1946_s13, %s1947_s14  }
  0x24   :  { %s1948_s26 = smov [#allocation2]   ;;  %s1949_s29 = smov [#allocation7]  }
  0x25   :  { %s23_s28 = sshll.u32 %s1948_s26, 4  ;;  %s47_s30 = sshll.u32 %s1949_s29, 4  ;;  %s24_s28 = int_to_ptr.vmem [resolvable:$true] %s23_s28  ;;  %s2050_s30 = int_to_ptr.vmem [resolvable:$true] %s47_s30 }
  0x26   :  { %s1848_s10 = scalar_lea.hbm %s2423_s1, 256 }
  0x27   :  { %p1849_p2 = scmp.ne.s32.totalorder %s2423_s1, %s1848_s10  ;;  %p1852_p3 = scmp.lt.u32.totalorder %s1848_s10, %s2423_s1 }
  0x29   :  { %p1854_p4 = pnand %p1852_p3, %p1849_p2 }
  0x2b   :  { %1857 = shalt.err (!%p1854_p4)
}
  0x2c   :  { %s1858_s4 = scalar_lea.vmem %s24_s28, 256  ;;  %p1863_p6 = scmp.lt.s32.totalorder %s24_s28, %s24_s28 }
  0x2d   :  { %p1859_p5 = scmp.ne.s32.totalorder %s24_s28, %s1858_s4  ;;  %p1864_p7 = scmp.lt.s32.totalorder %s1858_s4, %s1858_s4 }
  0x2f   :  { %p1865_p8 = por %p1864_p7, %p1863_p6 }
  0x31   :  { %p1866_p9 = pnand %p1865_p8, %p1859_p5 }
  0x33   :  { %1869 = shalt.err (!%p1866_p9)
}
  0x34   :  { %29 = dma.hbm_to_vmem [thread:$0]  %s2423_s1, 256, %s24_s28, [#allocation3], %s1946_s13, %s1946_s13, %s1947_s14  }
  0x35   :  { %s1870_s20 = scalar_lea.hbm %s2425_s3, 128 }
  0x36   :  { %p1871_p10 = scmp.ne.s32.totalorder %s2425_s3, %s1870_s20  ;;  %p1874_p11 = scmp.lt.u32.totalorder %s1870_s20, %s2425_s3 }
  0x38   :  { %p1876_p12 = pnand %p1874_p11, %p1871_p10 }
  0x3a   :  { %1879 = shalt.err (!%p1876_p12)
}
  0x3b   :  { %s1880_s2 = scalar_lea.vmem %s2050_s30, 128  ;;  %p1885_p0 = scmp.lt.s32.totalorder %s2050_s30, %s2050_s30 }
  0x3c   :  { %p1881_p13 = scmp.ne.s32.totalorder %s2050_s30, %s1880_s2  ;;  %p1886_p1 = scmp.lt.s32.totalorder %s1880_s2, %s1880_s2 }
  0x3e   :  { %p1887_p2 = por %p1886_p1, %p1885_p0 }
  0x40   :  { %p1888_p3 = pnand %p1887_p2, %p1881_p13 }
  0x42   :  { %1891 = shalt.err (!%p1888_p3)
}
  0x43   :  { %53 = dma.hbm_to_vmem [thread:$0]  %s2425_s3, 128, %s2050_s30, [#allocation6], %s1946_s13, %s1946_s13, %s1947_s14  }
  0x44   :  { %s1950_s26 = smov [#allocation10]   ;;  %s1892_s9 = scalar_lea.hbm %s2427_s5, 128 }
  0x45   :  { %s72_s28 = sshll.u32 %s1950_s26, 4  ;;  %p1893_p4 = scmp.ne.s32.totalorder %s2427_s5, %s1892_s9  ;;  %s73_s28 = int_to_ptr.vmem [resolvable:$true] %s72_s28 }
  0x46   :  { %p1896_p5 = scmp.lt.u32.totalorder %s1892_s9, %s2427_s5 }
  0x48   :  { %p1898_p6 = pnand %p1896_p5, %p1893_p4 }
  0x4a   :  { %1901 = shalt.err (!%p1898_p6)
}
  0x4b   :  { %s1902_s16 = scalar_lea.vmem %s73_s28, 128  ;;  %p1907_p8 = scmp.lt.s32.totalorder %s73_s28, %s73_s28 }
  0x4c   :  { %p1903_p7 = scmp.ne.s32.totalorder %s73_s28, %s1902_s16  ;;  %p1908_p9 = scmp.lt.s32.totalorder %s1902_s16, %s1902_s16 }
  0x4e   :  { %p1909_p10 = por %p1908_p9, %p1907_p8 }
  0x50   :  { %p1910_p11 = pnand %p1909_p10, %p1903_p7 }
  0x52   :  { %1913 = shalt.err (!%p1910_p11)
}
  0x53   :  { %75 = dma.hbm_to_vmem [thread:$0]  %s2427_s5, 128, %s73_s28, [#allocation9]  }
  0x54   :  { %1936 = dma.done.wait [#allocation3], 256  }
  0x55   :  { %1937 = vsyncadd [#allocation3], 4294967040 }
  0x56   :  { %1938 = dma.done.wait [#allocation6], 384  }
  0x57   :  { %1939 = vsyncadd [#allocation6], 4294966912 }
  0x58   :  { %1940 = dma.done.wait [#allocation9], 384  }
  0x59   :  { %1941 = vsyncadd [#allocation9], 4294966912  ;;  %v1951_v0 = vmov 0.0   ;;  %vm1952_vm0 = vmmov 0   ;;  %v1765_v1 = vld [vmem:[#allocation2] sm:$0xff]   ;;  %v1766_v2 = vld [vmem:[#allocation2 + $0x8] sm:$0xff]  }
  0x5a   :  { %1595 = vmatprep.subr.bf16.mxu0 %v1951_v0  ;;  %1599 = vmatprep.mubr.msk.bf16.mxu0 %vm1952_vm0, %v1951_v0  ;;  %v94_v3 = vld [vmem:[%s2422_s0] sm:$0xff]  ;;  %v95_v4 = vld [vmem:[%s2422_s0 + $0x8] sm:$0xff]  ;;  %v2111_v5 = vld [vmem:[#allocation10] sm:$0xff]  ;;  %vm113_vm1 = vcmask 261120   ;;  %s1953_s27 = smov 52   ;;  %s1954_s19 = smov 48  }
  0x5b   :  { %1603 = vmatprep.subr.bf16.mxu1 %v1951_v0  ;;  %1607 = vmatprep.mubr.msk.bf16.mxu1 %vm1952_vm0, %v1951_v0  ;;  %v276_v6 = vld [vmem:[%s2428_s6] sm:$0xff]  ;;  %v1767_v7 = vld [vmem:[#allocation5] sm:$0xff]   ;;  %v96_v8 = vpack.c.bf16 %v95_v4, %v94_v3  ;;  %v1768_v9 = vld [vmem:[#allocation5 + $0x8] sm:$0xff]   ;;  %s1955_s0 = smov 96   ;;  %s1956_s6 = smov 124   ;;  %vm230_vm2 = vcmask 130048  }
  0x5c   :  { %1596 = vmatpush3.bf16.msra.mxu0 %v1765_v1  ;;  %321 = vrot.lane.b32.xlu1 %v2111_v5, %s1953_s27  ;;  %v1769_v10 = vld [vmem:[#allocation7] sm:$0xff]   ;;  %s1957_s20 = smov 84   ;;  %s1958_s21 = smov 32   ;;  %vm338_vm3 = vcmask 31744   ;;  %vm348_vm4 = vcmask 64512   ;;  %vm350_vm5 = vcmask 97280  }
  0x5d   :  { %1597 = vmatprep.subr.bf16.mxu0 %v1951_v0  ;;  %1604 = vmatpush3.bf16.msra.mxu1 %v1767_v7  ;;  %s1959_s22 = smov 112   ;;  %s1960_s23 = smov 80   ;;  %vm428_vm6 = vcmask 1043456   ;;  %vm873_vm8 = vcmask 195584  }
  0x5e   :  { %1605 = vmatprep.subr.bf16.mxu1 %v1951_v0  ;;  %s1961_s24 = smov 8   ;;  %s1962_s2 = smov 108  }
  0x5f   :  { %s1963_s1 = smov 120   ;;  %s1964_s25 = smov 104  }
  0x60   :  { %1598 = vmatpush3.bf16.msra.mxu0 %v1766_v2  ;;  %288 = vrot.lane.b32.xlu1 %v276_v6, %s1954_s19  ;;  %s1965_s26 = smov 100   ;;  %s1966_s28 = smov 92  }
  0x61   :  { %1611 = vmatprep.subr.bf16.mxu0 %v1951_v0  ;;  %1606 = vmatpush3.bf16.msra.mxu1 %v1768_v9  ;;  %s1967_s29 = smov 88   ;;  %s1968_s8 = smov 72  }
  0x62   :  { %1617 = vmatprep.subr.bf16.mxu1 %v1951_v0  ;;  %s1969_s9 = smov 16   ;;  %s1970_s10 = smov 24  }
  0x63   :  { %1600 = vmatmul.mubr.msk.bf16.vlgmr.msra.gmra.mrb[0].mxu0 %vm113_vm1, %v96_v8  ;;  %s1971_s11 = smov [#allocation11]  }
  0x64   :  { %1613 = vmatprep.mubr.msk.bf16.mxu0 %vm1952_vm0, %v1951_v0  ;;  %1612 = vmatpush3.bf16.msra.mxu0 %v1769_v10  ;;  %s1511_s12 = sshll.u32 %s1971_s11, 4  ;;  %s1512_s12 = int_to_ptr.vmem [resolvable:$true] %s1511_s12 }
  0x65   :  { %1623 = vmatprep.subr.bf16.mxu0 %v1951_v0  ;;  %s1914_s15 = scalar_lea.vmem %s1512_s12, 256  ;;  %p1919_p13 = scmp.lt.s32.totalorder %s1512_s12, %s1512_s12 }
  0x66   :  { %p1915_p12 = scmp.ne.s32.totalorder %s1512_s12, %s1914_s15  ;;  %p1920_p0 = scmp.lt.s32.totalorder %s1914_s15, %s1914_s15 }
  0x68   :  { %p1921_p1 = por %p1920_p0, %p1919_p13 }
  0x6a   :  { %p1922_p2 = pnand %p1921_p1, %p1915_p12 }
  0xce   :  { %v322_v16 = vpop.permute.xlu1 %321 }
  0xd2   :  { %v289_v22 = vpop.permute.xlu1 %288 }
 0x136   :  { %v151_v11 = vpop.f32.mrb[0].mxu0 }
 0x137   :  { %v1601_v12 = vpop.f32.mrb[1].mxu0  ;;  %v324_v17 = vmul.f32 %v322_v16, %v151_v11  ;;  %v320_v25 = vmul.f32 %v289_v22, %v151_v11 }
 0x138   :  { %v154_v13 = vpop.f32.mrb[2].mxu0 }
 0x139   :  { %v1602_v14 = vpop.f32.mrb[3].mxu0  ;;  %v158_v15 = vpack.c.bf16 %v154_v13, %v151_v11  ;;  %v897_v18 = vmul.f32 %v322_v16, %v154_v13  ;;  %v896_v33 = vmul.f32 %v289_v22, %v154_v13 }
 0x13b   :  { %222 = vrot.lane.b32.xlu0 %v158_v15, %s1955_s0  ;;  %1608 = vmatmul.mubr.msk.bf16.vlgmr.msra.gmra.mrb[0].mxu1 %vm113_vm1, %v158_v15 }
 0x13c   :  { %1619 = vmatprep.mubr.msk.bf16.mxu1 %vm1952_vm0, %v1951_v0 }
 0x13f   :  { %311 = vrot.lane.b32.xlu0 %v276_v6, %s1953_s27 }
 0x143   :  { %301 = vrot.lane.b32.xlu0 %v2111_v5, %s1954_s19 }
 0x147   :  { %326 = vrot.lane.b32.xlu0 %v324_v17, %s1956_s6 }
 0x14b   :  { %899 = vrot.lane.b32.xlu0 %v897_v18, %s1956_s6 }
 0x1ad   :  { %v223_v19 = vpop.permute.xlu0 %222 }
 0x1ae   :  { %1614 = vmatmul.mubr.msk.bf16.vlgmr.msra.gmra.mrb[4].mxu0 %vm230_vm2, %v223_v19 }
 0x1af   :  { %1625 = vmatprep.mubr.msk.bf16.mxu0 %vm1952_vm0, %v1951_v0 }
 0x1b1   :  { %v312_v20 = vpop.permute.xlu0 %311 }
 0x1b2   :  { %v314_v21 = vmul.f32 %v312_v20, %v151_v11  ;;  %v890_v24 = vmul.f32 %v312_v20, %v154_v13 }
 0x1b4   :  { %316 = vrot.lane.b32.xlu1 %v314_v21, %s1956_s6 }
 0x1b5   :  { %v302_v23 = vpop.permute.xlu0 %301 }
 0x1b6   :  { %v310_v37 = vmul.f32 %v302_v23, %v151_v11  ;;  %v889_v42 = vmul.f32 %v302_v23, %v154_v13 }
 0x1b8   :  { %892 = vrot.lane.b32.xlu1 %v890_v24, %s1956_s6 }
 0x1b9   :  { %v327_v26 = vpop.permute.xlu0 %326 }
 0x1ba   :  { %v329_v27 = vadd.f32 %v327_v26, %v320_v25 }
 0x1bc   :  { %335 = vrot.lane.b32.xlu0 %v329_v27, %s1957_s20 }
 0x1bd   :  { %v900_v31 = vpop.permute.xlu0 %899 }
 0x1be   :  { %v902_v35 = vadd.f32 %v900_v31, %v896_v33 }
 0x1c0   :  { %297 = vrot.lane.b32.xlu0 %v276_v6, %s1958_s21 }
 0x20e   :  { %v2133_v28 = vpop.f32.mrb[0].mxu1 }
 0x20f   :  { %v1609_v29 = vpop.f32.mrb[1].mxu1  ;;  %v304_v30 = vmul.f32 %v302_v23, %v2133_v28  ;;  %v291_v40 = vmul.f32 %v289_v22, %v2133_v28 }
 0x210   :  { %v2136_v32 = vpop.f32.mrb[2].mxu1 }
 0x211   :  { %306 = vrot.lane.b32.xlu0 %v304_v30, %s1959_s22  ;;  %v1610_v34 = vpop.f32.mrb[3].mxu1  ;;  %v883_v36 = vmul.f32 %v302_v23, %v2136_v32  ;;  %v876_v44 = vmul.f32 %v289_v22, %v2136_v32 }
 0x215   :  { %908 = vrot.lane.b32.xlu0 %v902_v35, %s1957_s20 }
 0x219   :  { %885 = vrot.lane.b32.xlu0 %v883_v36, %s1959_s22 }
 0x226   :  { %v317_v38 = vpop.permute.xlu1 %316 }
 0x227   :  { %v319_v39 = vsub.f32 %v310_v37, %v317_v38 }
 0x229   :  { %331 = vrot.lane.b32.xlu1 %v319_v39, %s1960_s23 }
 0x22a   :  { %v893_v41 = vpop.permute.xlu1 %892 }
 0x22b   :  { %v895_v43 = vsub.f32 %v889_v42, %v893_v41 }
 0x22d   :  { %283 = vrot.lane.b32.xlu1 %v2111_v5, %s1958_s21 }
 0x22e   :  { %v336_v49 = vpop.permute.xlu0 %335 }
 0x231   :  { %293 = vrot.lane.b32.xlu1 %v291_v40, %s1959_s22 }
 0x232   :  { %v298_v50 = vpop.permute.xlu0 %297 }
 0x233   :  { %v300_v54 = vmul.f32 %v298_v50, %v2133_v28  ;;  %v882_v4 = vmul.f32 %v298_v50, %v2136_v32 }
 0x235   :  { %904 = vrot.lane.b32.xlu1 %v895_v43, %s1960_s23 }
 0x239   :  { %878 = vrot.lane.b32.xlu1 %v876_v44, %s1959_s22 }
 0x281   :  { %v2148_v45 = vpop.f32.mrb[4].mxu0 }
 0x282   :  { %v1615_v46 = vpop.f32.mrb[5].mxu0  ;;  %v2197_v6 = vpack.c.bf16 %v2148_v45, %v2148_v45 }
 0x283   :  { %v2150_v47 = vpop.f32.mrb[6].mxu0  ;;  %v307_v52 = vpop.permute.xlu0 %306 }
 0x284   :  { %v1616_v48 = vpop.f32.mrb[7].mxu0  ;;  %v309_v55 = vadd.f32 %v307_v52, %v300_v54 }
 0x287   :  { %v909_v63 = vpop.permute.xlu0 %908 }
 0x28b   :  { %v886_v2 = vpop.permute.xlu0 %885 }
 0x28c   :  { %v888_v5 = vadd.f32 %v886_v2, %v882_v4 }
 0x29b   :  { %v332_v51 = vpop.permute.xlu1 %331 }
 0x29c   :  { %v339_v53 = vsel %vm338_vm3, %v332_v51, %v336_v49 }
 0x29d   :  { %353 = vrot.lane.b32.xlu1 %v339_v53, %s1961_s24 }
 0x29f   :  { %v284_v56 = vpop.permute.xlu1 %283 }
 0x2a0   :  { %v286_v57 = vmul.f32 %v284_v56, %v2133_v28  ;;  %v875_v62 = vmul.f32 %v284_v56, %v2136_v32 }
 0x2a1   :  { %345 = vrot.lane.b32.xlu1 %v309_v55, %s1962_s2 }
 0x2a3   :  { %v294_v58 = vpop.permute.xlu1 %293 }
 0x2a4   :  { %v296_v59 = vsub.f32 %v286_v57, %v294_v58 }
 0x2a5   :  { %474 = vrot.lane.b32.xlu1 %v2133_v28, %s1963_s1 }
 0x2a6   :  { %341 = vrot.lane.b32.xlu0 %v296_v59, %s1964_s25 }
 0x2a7   :  { %v905_v60 = vpop.permute.xlu1 %904 }
 0x2a8   :  { %v911_v3 = vsel %vm338_vm3, %v905_v60, %v909_v63 }
 0x2a9   :  { %480 = vrot.lane.b32.xlu1 %v309_v55, %s1964_s25 }
 0x2aa   :  { %486 = vrot.lane.b32.xlu0 %v2148_v45, %s1963_s1 }
 0x2ab   :  { %v879_v61 = vpop.permute.xlu1 %878 }
 0x2ac   :  { %v881_v1 = vsub.f32 %v875_v62, %v879_v61 }
 0x2ad   :  { %603 = vrot.lane.b32.xlu1 %v2133_v28, %s1959_s22 }
 0x2ae   :  { %477 = vrot.lane.b32.xlu0 %v296_v59, %s1965_s26 }
 0x2b1   :  { %609 = vrot.lane.b32.xlu1 %v309_v55, %s1965_s26 }
 0x2b2   :  { %614 = vrot.lane.b32.xlu0 %v2148_v45, %s1959_s22 }
 0x2b5   :  { %731 = vrot.lane.b32.xlu1 %v2133_v28, %s1964_s25 }
 0x2b6   :  { %606 = vrot.lane.b32.xlu0 %v296_v59, %s1955_s0 }
 0x2b9   :  { %737 = vrot.lane.b32.xlu1 %v309_v55, %s1955_s0 }
 0x2ba   :  { %742 = vrot.lane.b32.xlu0 %v2148_v45, %s1964_s25 }
 0x2bd   :  { %913 = vrot.lane.b32.xlu1 %v881_v1, %s1964_s25 }
 0x2be   :  { %734 = vrot.lane.b32.xlu0 %v296_v59, %s1966_s28 }
 0x2c1   :  { %1055 = vrot.lane.b32.xlu1 %v2150_v47, %s1963_s1 }
 0x2c2   :  { %923 = vrot.lane.b32.xlu0 %v911_v3, %s1961_s24 }
 0x2c5   :  { %1046 = vrot.lane.b32.xlu1 %v881_v1, %s1965_s26 }
 0x2c6   :  { %917 = vrot.lane.b32.xlu0 %v888_v5, %s1962_s2 }
 0x2c9   :  { %1183 = vrot.lane.b32.xlu1 %v2150_v47, %s1959_s22 }
 0x2ca   :  { %1043 = vrot.lane.b32.xlu0 %v2136_v32, %s1963_s1 }
 0x2cd   :  { %1175 = vrot.lane.b32.xlu1 %v881_v1, %s1955_s0 }
 0x2ce   :  { %1049 = vrot.lane.b32.xlu0 %v888_v5, %s1964_s25 }
 0x2d1   :  { %1311 = vrot.lane.b32.xlu1 %v2150_v47, %s1964_s25 }
 0x2d2   :  { %1172 = vrot.lane.b32.xlu0 %v2136_v32, %s1959_s22 }
 0x2d5   :  { %1303 = vrot.lane.b32.xlu1 %v881_v1, %s1966_s28 }
 0x2d6   :  { %1178 = vrot.lane.b32.xlu0 %v888_v5, %s1965_s26 }
 0x2d9   :  { %554 = vrot.lane.b32.xlu1 %v2197_v6, %s1967_s29 }
 0x2da   :  { %1300 = vrot.lane.b32.xlu0 %v2136_v32, %s1964_s25 }
 0x2de   :  { %1306 = vrot.lane.b32.xlu0 %v888_v5, %s1955_s0 }
 0x2e2   :  { %423 = vrot.lane.b32.xlu0 %v2197_v6, %s1955_s0 }
 0x30f   :  { %v354_v7 = vpop.permute.xlu1 %353 }
 0x310   :  { %v356_v8 = vsel %vm348_vm4, %v2148_v45, %v354_v7 }
 0x311   :  { %v358_v9 = vpack.c.bf16 %v356_v8, %v356_v8 }
 0x313   :  { %v346_v10 = vpop.permute.xlu1 %345  ;;  %v363_v11 = vsel %vm230_vm2, %v358_v9, 0 }
 0x314   :  { %1618 = vmatpush3.bf16.xpose.msra.mxu1 %v363_v11 }
 0x315   :  { %1629 = vmatprep.subr.bf16.mxu1 %v1951_v0 }
 0x317   :  { %v475_v12 = vpop.permute.xlu1 %474 }
 0x318   :  { %v342_v13 = vpop.permute.xlu0 %341 }
 0x319   :  { %v349_v14 = vsel %vm348_vm4, %v2133_v28, %v342_v13 }
 0x31a   :  { %v351_v15 = vsel %vm350_vm5, %v349_v14, %v346_v10 }
 0x31b   :  { %v357_v16 = vpack.c.bf16 %v351_v15, %v351_v15  ;;  %v481_v17 = vpop.permute.xlu1 %480 }
 0x31c   :  { %v487_v18 = vpop.permute.xlu0 %486 }
 0x31d   :  { %v489_v19 = vsel %vm348_vm4, %v487_v18, %v354_v7  ;;  %1620 = vmatmul.mubr.msk.bf16.vlgmr.msra.gmra.mrb[4].mxu1 %vm230_vm2, %v357_v16 }
 0x31e   :  { %v491_v20 = vpack.c.bf16 %v489_v19, %v489_v19  ;;  %1631 = vmatprep.mubr.msk.bf16.mxu1 %vm1952_vm0, %v1951_v0 }
 0x31f   :  { %v604_v21 = vpop.permute.xlu1 %603 }
 0x320   :  { %v478_v22 = vpop.permute.xlu0 %477  ;;  %v496_v23 = vsel %vm230_vm2, %v491_v20, 0 }
 0x321   :  { %v483_v24 = vsel %vm348_vm4, %v475_v12, %v478_v22  ;;  %1630 = vmatpush3.bf16.xpose.msra.mxu1 %v496_v23 }
 0x322   :  { %1641 = vmatprep.subr.bf16.mxu1 %v1951_v0  ;;  %v484_v25 = vsel %vm350_vm5, %v483_v24, %v481_v17 }
 0x323   :  { %v610_v26 = vpop.permute.xlu1 %609  ;;  %v490_v29 = vpack.c.bf16 %v484_v25, %v484_v25 }
 0x324   :  { %v615_v27 = vpop.permute.xlu0 %614 }
 0x325   :  { %v617_v28 = vsel %vm348_vm4, %v615_v27, %v354_v7 }
 0x326   :  { %v619_v30 = vpack.c.bf16 %v617_v28, %v617_v28 }
 0x327   :  { %v732_v31 = vpop.permute.xlu1 %731 }
 0x328   :  { %v607_v33 = vpop.permute.xlu0 %606  ;;  %1632 = vmatmul.mubr.msk.bf16.vlgmr.msra.gmra.mrb[8].mxu1 %vm230_vm2, %v490_v29  ;;  %v624_v34 = vsel %vm230_vm2, %v619_v30, 0 }
 0x329   :  { %v612_v35 = vsel %vm348_vm4, %v604_v21, %v607_v33  ;;  %1642 = vmatpush3.bf16.xpose.msra.mxu1 %v624_v34  ;;  %1643 = vmatprep.mubr.msk.bf16.mxu1 %vm1952_vm0, %v1951_v0 }
 0x32a   :  { %1653 = vmatprep.subr.bf16.mxu1 %v1951_v0  ;;  %v613_v36 = vsel %vm350_vm5, %v612_v35, %v610_v26  ;;  %v277_v26 = vlaneseq }
 0x32b   :  { %v738_v37 = vpop.permute.xlu1 %737  ;;  %v618_v40 = vpack.c.bf16 %v613_v36, %v613_v36 }
 0x32c   :  { %v743_v38 = vpop.permute.xlu0 %742  ;;  %v278_v27 = vshrl.u32 %v277_v26, 7  ;;  %v280_v28 = vand.u32 127, %v277_v26 }
 0x32d   :  { %v745_v39 = vsel %vm348_vm4, %v743_v38, %v354_v7 }
 0x32e   :  { %v747_v41 = vpack.c.bf16 %v745_v39, %v745_v39  ;;  %vm2276_vm7 = vcmp.le.s32.totalorder %v280_v28, %v278_v27 }
 0x32f   :  { %v914_v42 = vpop.permute.xlu1 %913 }
 0x330   :  { %v735_v43 = vpop.permute.xlu0 %734  ;;  %1644 = vmatmul.mubr.msk.bf16.vlgmr.msra.gmra.mrb[12].mxu1 %vm230_vm2, %v618_v40  ;;  %v752_v44 = vsel %vm230_vm2, %v747_v41, 0  ;;  %v920_v57 = vsel %vm348_vm4, %v2136_v32, %v914_v42 }
 0x331   :  { %v740_v45 = vsel %vm348_vm4, %v732_v31, %v735_v43  ;;  %1654 = vmatpush3.bf16.xpose.msra.mxu1 %v752_v44  ;;  %1655 = vmatprep.mubr.msk.bf16.mxu1 %vm1952_vm0, %v1951_v0 }
 0x332   :  { %1665 = vmatprep.subr.bf16.mxu1 %v1951_v0  ;;  %v741_v46 = vsel %vm350_vm5, %v740_v45, %v738_v37 }
 0x333   :  { %v1056_v48 = vpop.permute.xlu1 %1055  ;;  %v746_v51 = vpack.c.bf16 %v741_v46, %v741_v46 }
 0x334   :  { %v924_v49 = vpop.permute.xlu0 %923 }
 0x335   :  { %v926_v50 = vsel %vm348_vm4, %v2150_v47, %v924_v49  ;;  %v1058_v56 = vsel %vm348_vm4, %v1056_v48, %v924_v49 }
 0x336   :  { %v928_v52 = vpack.c.bf16 %v926_v50, %v926_v50  ;;  %v1060_v61 = vpack.c.bf16 %v1058_v56, %v1058_v56 }
 0x337   :  { %v1047_v53 = vpop.permute.xlu1 %1046 }
 0x338   :  { %v918_v54 = vpop.permute.xlu0 %917  ;;  %1656 = vmatmul.mubr.msk.bf16.vlgmr.msra.gmra.mrb[16].mxu1 %vm230_vm2, %v746_v51  ;;  %v933_v55 = vsel %vm230_vm2, %v928_v52, 0  ;;  %v1065_v2 = vsel %vm230_vm2, %v1060_v61, 0 }
 0x339   :  { %1666 = vmatpush3.bf16.xpose.msra.mxu1 %v933_v55  ;;  %1667 = vmatprep.mubr.msk.bf16.mxu1 %vm1952_vm0, %v1951_v0  ;;  %v921_v58 = vsel %vm350_vm5, %v920_v57, %v918_v54 }
 0x33a   :  { %1677 = vmatprep.subr.bf16.mxu1 %v1951_v0  ;;  %v927_v62 = vpack.c.bf16 %v921_v58, %v921_v58 }
 0x33b   :  { %v1184_v59 = vpop.permute.xlu1 %1183 }
 0x33c   :  { %v1044_v60 = vpop.permute.xlu0 %1043  ;;  %v1186_v3 = vsel %vm348_vm4, %v1184_v59, %v924_v49 }
 0x33d   :  { %v1052_v32 = vsel %vm348_vm4, %v1044_v60, %v1047_v53  ;;  %v1188_v5 = vpack.c.bf16 %v1186_v3, %v1186_v3 }
 0x33f   :  { %v1176_v63 = vpop.permute.xlu1 %1175  ;;  %v1193_v11 = vsel %vm230_vm2, %v1188_v5, 0 }
 0x340   :  { %v1050_v1 = vpop.permute.xlu0 %1049  ;;  %1668 = vmatmul.mubr.msk.bf16.vlgmr.msra.gmra.mrb[20].mxu1 %vm230_vm2, %v927_v62 }
 0x341   :  { %1678 = vmatpush3.bf16.xpose.msra.mxu1 %v1065_v2  ;;  %1679 = vmatprep.mubr.msk.bf16.mxu1 %vm1952_vm0, %v1951_v0  ;;  %v1053_v4 = vsel %vm350_vm5, %v1052_v32, %v1050_v1 }
 0x342   :  { %1689 = vmatprep.subr.bf16.mxu1 %v1951_v0  ;;  %v1059_v8 = vpack.c.bf16 %v1053_v4, %v1053_v4 }
 0x343   :  { %v1312_v9 = vpop.permute.xlu1 %1311 }
 0x344   :  { %v1173_v7 = vpop.permute.xlu0 %1172  ;;  %v1314_v12 = vsel %vm348_vm4, %v1312_v9, %v924_v49 }
 0x345   :  { %v1181_v13 = vsel %vm348_vm4, %v1173_v7, %v1176_v63  ;;  %v1316_v15 = vpack.c.bf16 %v1314_v12, %v1314_v12 }
 0x347   :  { %v1321_v19 = vsel %vm230_vm2, %v1316_v15, 0  ;;  %v1304_v20 = vpop.permute.xlu1 %1303 }
 0x348   :  { %v1179_v10 = vpop.permute.xlu0 %1178  ;;  %1680 = vmatmul.mubr.msk.bf16.vlgmr.msra.gmra.mrb[24].mxu1 %vm230_vm2, %v1059_v8 }
 0x349   :  { %1690 = vmatpush3.bf16.xpose.msra.mxu1 %v1193_v11  ;;  %1691 = vmatprep.mubr.msk.bf16.mxu1 %vm1952_vm0, %v1951_v0  ;;  %v1182_v14 = vsel %vm350_vm5, %v1181_v13, %v1179_v10 }
 0x34a   :  { %1701 = vmatprep.subr.bf16.mxu1 %v1951_v0  ;;  %v1187_v17 = vpack.c.bf16 %v1182_v14, %v1182_v14 }
 0x34c   :  { %v1301_v16 = vpop.permute.xlu0 %1300 }
 0x34d   :  { %v1309_v21 = vsel %vm348_vm4, %v1301_v16, %v1304_v20 }
 0x350   :  { %v1307_v18 = vpop.permute.xlu0 %1306  ;;  %1692 = vmatmul.mubr.msk.bf16.vlgmr.msra.gmra.mrb[28].mxu1 %vm230_vm2, %v1187_v17 }
 0x351   :  { %1702 = vmatpush3.bf16.xpose.msra.mxu1 %v1321_v19  ;;  %1703 = vmatprep.mubr.msk.bf16.mxu1 %vm1952_vm0, %v1951_v0  ;;  %v1310_v22 = vsel %vm350_vm5, %v1309_v21, %v1307_v18 }
 0x352   :  { %1713 = vmatprep.subr.bf16.mxu1 %v1951_v0  ;;  %v1315_v25 = vpack.c.bf16 %v1310_v22, %v1310_v22 }
 0x354   :  { %v424_v23 = vpop.permute.xlu0 %423 }
 0x355   :  { %v430_v24 = vsel %vm428_vm6, %v424_v23, 0 }
 0x356   :  { %1624 = vmatpush3.bf16.msra.mxu0 %v430_v24  ;;  %v991_v24 = vpack.c.bf16 %v2150_v47, %v2150_v47 }
 0x357   :  { %1635 = vmatprep.subr.bf16.mxu0 %v1951_v0 }
 0x358   :  { %1704 = vmatmul.mubr.msk.bf16.vlgmr.msra.gmra.mrb[32].mxu1 %vm230_vm2, %v1315_v25  ;;  %v555_v25 = vpop.permute.xlu1 %554 }
 0x359   :  { %1717 = vmatprep.mubr.msk.bf16.mxu1 %vm1952_vm0, %v1951_v0 }
 0x3f0   :  { %v399_v29 = vpop.f32.mrb[4].mxu1 }
 0x3f1   :  { %v405_v31 = vmul.f32 0.28867513, %v399_v29  ;;  %v1621_v33 = vpop.f32.mrb[5].mxu1 }
 0x3f2   :  { %v402_v34 = vpop.f32.mrb[6].mxu1 }
 0x3f3   :  { %v1622_v35 = vpop.f32.mrb[7].mxu1  ;;  %v2282_v36 = vsel %vm2276_vm7, %v405_v31, -1e+30  ;;  %v560_v34 = vsel %vm428_vm6, %v555_v25, 0 }
 0x3f4   :  { %v407_v37 = vsel %vm348_vm4, %v2282_v36, -inf }
 0x3f5   :  { %408 = vmax.xlane.f32.xlu1 %v407_v37 }
 0x3fb   :  { %v532_v38 = vpop.f32.mrb[8].mxu1 }
 0x3fc   :  { %v538_v39 = vmul.f32 0.28867513, %v532_v38  ;;  %v1633_v40 = vpop.f32.mrb[9].mxu1 }
 0x3fd   :  { %v535_v41 = vpop.f32.mrb[10].mxu1 }
 0x3fe   :  { %v1634_v42 = vpop.f32.mrb[11].mxu1  ;;  %v2288_v43 = vsel %vm2276_vm7, %v538_v39, -1e+30 }
 0x3ff   :  { %v540_v44 = vsel %vm348_vm4, %v2288_v43, -inf }
 0x400   :  { %541 = vmax.xlane.f32.xlu0 %v540_v44 }
 0x403   :  { %v660_v45 = vpop.f32.mrb[12].mxu1 }
 0x404   :  { %v666_v46 = vmul.f32 0.28867513, %v660_v45  ;;  %v1645_v48 = vpop.f32.mrb[13].mxu1 }
 0x405   :  { %v663_v49 = vpop.f32.mrb[14].mxu1 }
 0x406   :  { %v1646_v50 = vpop.f32.mrb[15].mxu1  ;;  %682 = vrot.lane.b32.xlu1 %v2197_v6, %s1960_s23  ;;  %v2296_v51 = vsel %vm2276_vm7, %v666_v46, -1e+30 }
 0x407   :  { %v668_v52 = vsel %vm348_vm4, %v2296_v51, -inf }
 0x408   :  { %669 = vmax.xlane.f32.xlu0 %v668_v52 }
 0x40b   :  { %v788_v53 = vpop.f32.mrb[16].mxu1 }
 0x40c   :  { %v1657_v54 = vpop.f32.mrb[17].mxu1  ;;  %v794_v32 = vmul.f32 0.28867513, %v788_v53 }
 0x40d   :  { %v791_v55 = vpop.f32.mrb[18].mxu1 }
 0x40e   :  { %v1658_v56 = vpop.f32.mrb[19].mxu1  ;;  %v2308_v10 = vsel %vm2276_vm7, %v794_v32, -1e+30 }
 0x40f   :  { %v796_v11 = vsel %vm348_vm4, %v2308_v10, -inf }
 0x413   :  { %v969_v57 = vpop.f32.mrb[20].mxu1 }
 0x414   :  { %v1669_v58 = vpop.f32.mrb[21].mxu1  ;;  %v975_v8 = vmul.f32 0.28867513, %v969_v57 }
 0x415   :  { %v972_v59 = vpop.f32.mrb[22].mxu1 }
 0x416   :  { %v1670_v60 = vpop.f32.mrb[23].mxu1 }
 0x41b   :  { %v1101_v61 = vpop.f32.mrb[24].mxu1 }
 0x41c   :  { %v1107_v62 = vmul.f32 0.28867513, %v1101_v61  ;;  %v1681_v63 = vpop.f32.mrb[25].mxu1 }
 0x41d   :  { %v1104_v1 = vpop.f32.mrb[26].mxu1 }
 0x41e   :  { %810 = vrot.lane.b32.xlu0 %v2197_v6, %s1968_s8  ;;  %v1682_v2 = vpop.f32.mrb[27].mxu1  ;;  %v2304_v3 = vsel %vm2276_vm7, %v1107_v62, -1e+30  ;;  %v2314_v6 = vsel %vm2276_vm7, %v975_v8, -1e+30 }
 0x41f   :  { %v977_v17 = vsel %vm348_vm4, %v2314_v6, -inf  ;;  %v1109_v23 = vsel %vm348_vm4, %v2304_v3, -inf }
 0x423   :  { %v1229_v4 = vpop.f32.mrb[28].mxu1 }
 0x424   :  { %v1693_v5 = vpop.f32.mrb[29].mxu1  ;;  %v1235_v12 = vmul.f32 0.28867513, %v1229_v4 }
 0x425   :  { %v1232_v7 = vpop.f32.mrb[30].mxu1 }
 0x426   :  { %v1694_v9 = vpop.f32.mrb[31].mxu1  ;;  %v2320_v19 = vsel %vm2276_vm7, %v1235_v12, -1e+30 }
 0x427   :  { %v1237_v21 = vsel %vm348_vm4, %v2320_v19, -inf }
 0x42a   :  { %797 = vmax.xlane.f32.xlu1 %v796_v11 }
 0x42b   :  { %v1357_v13 = vpop.f32.mrb[32].mxu1 }
 0x42c   :  { %v1363_v14 = vmul.f32 0.28867513, %v1357_v13  ;;  %v1705_v15 = vpop.f32.mrb[33].mxu1 }
 0x42d   :  { %v1360_v16 = vpop.f32.mrb[34].mxu1 }
 0x42e   :  { %978 = vmax.xlane.f32.xlu1 %v977_v17  ;;  %v1706_v18 = vpop.f32.mrb[35].mxu1  ;;  %v2324_v20 = vsel %vm2276_vm7, %v1363_v14, -1e+30 }
 0x42f   :  { %v1365_v22 = vsel %vm348_vm4, %v2324_v20, -inf }
 0x432   :  { %1238 = vmax.xlane.f32.xlu1 %v1237_v21 }
 0x436   :  { %1366 = vmax.xlane.f32.xlu1 %v1365_v22 }
 0x43d   :  { %1110 = vmax.xlane.f32.xlu0 %v1109_v23 }
 0x447   :  { %993 = vrot.lane.b32.xlu1 %v991_v24, %s1955_s0 }
 0x453   :  { %1123 = vrot.lane.b32.xlu0 %v991_v24, %s1967_s29 }
 0x457   :  { %1251 = vrot.lane.b32.xlu0 %v991_v24, %s1960_s23 }
 0x45b   :  { %1379 = vrot.lane.b32.xlu0 %v991_v24, %s1968_s8 }
 0x482   :  { %v409_v26 = vpop.xlane.xlu1 %408 }
 0x483   :  { %v410_v27 = vsub.f32 %v2282_v36, %v409_v26 }
 0x485   :  { %v411_v28 = vmul.f32 1.442695, %v410_v27 }
 0x486   :  { %v683_v39 = vpop.permute.xlu1 %682 }
 0x487   :  { %1772 = vpow2.f32 %v411_v28  ;;  %v688_v42 = vsel %vm428_vm6, %v683_v39, 0 }
 0x48d   :  { %v542_v29 = vpop.xlane.xlu0 %541 }
 0x48e   :  { %v543_v30 = vsub.f32 %v2288_v43, %v542_v29 }
 0x490   :  { %v544_v31 = vmul.f32 1.442695, %v543_v30 }
 0x491   :  { %v2340_v33 = vpop.eup %1772 }
 0x492   :  { %1774 = vpow2.f32 %v544_v31  ;;  %v420_v47 = vpack.c.bf16 %v2340_v33, %v2340_v33 }
 0x494   :  { %1626 = vmatmul.mubr.msk.bf16.vlgmr.msra.gmra.mrb[8].mxu0 %vm348_vm4, %v420_v47 }
 0x495   :  { %1636 = vmatpush3.bf16.msra.mxu0 %v560_v34  ;;  %v670_v35 = vpop.xlane.xlu0 %669  ;;  %1637 = vmatprep.mubr.msk.bf16.mxu0 %vm1952_vm0, %v1951_v0 }
 0x496   :  { %v671_v36 = vsub.f32 %v2296_v51, %v670_v35  ;;  %1647 = vmatprep.subr.bf16.mxu0 %v1951_v0 }
 0x498   :  { %v672_v37 = vmul.f32 1.442695, %v671_v36 }
 0x499   :  { %v811_v44 = vpop.permute.xlu0 %810 }
 0x49a   :  { %1776 = vpow2.f32 %v672_v37  ;;  %v816_v48 = vsel %vm428_vm6, %v811_v44, 0 }
 0x49c   :  { %v1775_v38 = vpop.eup %1774 }
 0x49d   :  { %v546_v40 = vsel %vm348_vm4, %v1775_v38, 0.0  ;;  %v553_v41 = vpack.c.bf16 %v1775_v38, %v1775_v38 }
 0x49e   :  { %547 = vadd.xlane.f32.xlu1 %v546_v40 }
 0x49f   :  { %1638 = vmatmul.mubr.msk.bf16.vlgmr.msra.gmra.mrb[12].mxu0 %vm348_vm4, %v553_v41 }
 0x4a0   :  { %1648 = vmatpush3.bf16.msra.mxu0 %v688_v42  ;;  %1649 = vmatprep.mubr.msk.bf16.mxu0 %vm1952_vm0, %v1951_v0 }
 0x4a1   :  { %1659 = vmatprep.subr.bf16.mxu0 %v1951_v0 }
 0x4a4   :  { %v1777_v43 = vpop.eup %1776 }
 0x4a5   :  { %v674_v45 = vsel %vm348_vm4, %v1777_v43, 0.0  ;;  %v681_v46 = vpack.c.bf16 %v1777_v43, %v1777_v43 }
 0x4a6   :  { %675 = vadd.xlane.f32.xlu0 %v674_v45 }
 0x4a7   :  { %1650 = vmatmul.mubr.msk.bf16.vlgmr.msra.gmra.mrb[16].mxu0 %vm348_vm4, %v681_v46 }
 0x4a8   :  { %1660 = vmatpush3.bf16.msra.mxu0 %v816_v48  ;;  %1661 = vmatprep.mubr.msk.bf16.mxu0 %vm1952_vm0, %v1951_v0 }
 0x4a9   :  { %1671 = vmatprep.subr.bf16.mxu0 %v1951_v0 }
 0x4b7   :  { %v798_v49 = vpop.xlane.xlu1 %797 }
 0x4b8   :  { %v799_v50 = vsub.f32 %v2308_v10, %v798_v49 }
 0x4ba   :  { %v800_v51 = vmul.f32 1.442695, %v799_v50 }
 0x4bb   :  { %v979_v52 = vpop.xlane.xlu1 %978 }
 0x4bc   :  { %1778 = vpow2.f32 %v800_v51  ;;  %v980_v53 = vsub.f32 %v2314_v6, %v979_v52 }
 0x4be   :  { %v981_v54 = vmul.f32 1.442695, %v980_v53 }
 0x4bf   :  { %v1239_v55 = vpop.xlane.xlu1 %1238 }
 0x4c0   :  { %v1240_v56 = vsub.f32 %v2320_v19, %v1239_v55  ;;  %1780 = vpow2.f32 %v981_v54 }
 0x4c2   :  { %v1241_v57 = vmul.f32 1.442695, %v1240_v56 }
 0x4c3   :  { %v1367_v58 = vpop.xlane.xlu1 %1366 }
 0x4c4   :  { %1782 = vpow2.f32 %v1241_v57  ;;  %v1368_v59 = vsub.f32 %v2324_v20, %v1367_v58  ;;  %v413_v20 = vsel %vm348_vm4, %v2340_v33, 0.0 }
 0x4c6   :  { %v1779_v60 = vpop.eup %1778  ;;  %v1369_v61 = vmul.f32 1.442695, %v1368_v59 }
 0x4c7   :  { %v994_v62 = vpop.permute.xlu1 %993  ;;  %v809_v63 = vpack.c.bf16 %v1779_v60, %v1779_v60  ;;  %v802_v18 = vsel %vm348_vm4, %v1779_v60, 0.0 }
 0x4c8   :  { %1784 = vpow2.f32 %v1369_v61  ;;  %v999_v1 = vsel %vm428_vm6, %v994_v62, 0 }
 0x4c9   :  { %1662 = vmatmul.mubr.msk.bf16.vlgmr.msra.gmra.mrb[20].mxu0 %vm348_vm4, %v809_v63 }
 0x4ca   :  { %1672 = vmatpush3.bf16.msra.mxu0 %v999_v1  ;;  %v1111_v2 = vpop.xlane.xlu0 %1110  ;;  %1673 = vmatprep.mubr.msk.bf16.mxu0 %vm1952_vm0, %v1951_v0  ;;  %v1781_v4 = vpop.eup %1780 }
 0x4cb   :  { %v1112_v32 = vsub.f32 %v2304_v3, %v1111_v2  ;;  %1683 = vmatprep.subr.bf16.mxu0 %v1951_v0  ;;  %v990_v11 = vpack.c.bf16 %v1781_v4, %v1781_v4  ;;  %v983_v6 = vsel %vm348_vm4, %v1781_v4, 0.0 }
 0x4cd   :  { %v1113_v5 = vmul.f32 1.442695, %v1112_v32 }
 0x4ce   :  { %v1783_v7 = vpop.eup %1782  ;;  %v1124_v8 = vpop.permute.xlu0 %1123 }
 0x4cf   :  { %1786 = vpow2.f32 %v1113_v5  ;;  %v1129_v9 = vsel %vm428_vm6, %v1124_v8, 0  ;;  %v1243_v10 = vsel %vm348_vm4, %v1783_v7, 0.0  ;;  %v1250_v21 = vpack.c.bf16 %v1783_v7, %v1783_v7  ;;  %v1770_v5 = vld [vmem:[#allocation8] sm:$0xff]  }
 0x4d0   :  { %1244 = vadd.xlane.f32.xlu1 %v1243_v10  ;;  %1714 = vmatpush3.bf16.msra.mxu1 %v1770_v5 }
 0x4d1   :  { %1674 = vmatmul.mubr.msk.bf16.vlgmr.msra.gmra.mrb[24].mxu0 %vm348_vm4, %v990_v11  ;;  %1715 = vmatprep.subr.bf16.mxu1 %v1951_v0 }
 0x4d2   :  { %v1785_v12 = vpop.eup %1784  ;;  %1684 = vmatpush3.bf16.msra.mxu0 %v1129_v9  ;;  %1685 = vmatprep.mubr.msk.bf16.mxu0 %vm1952_vm0, %v1951_v0  ;;  %v1252_v14 = vpop.permute.xlu0 %1251 }
 0x4d3   :  { %v1371_v3 = vsel %vm348_vm4, %v1785_v12, 0.0  ;;  %1695 = vmatprep.subr.bf16.mxu0 %v1951_v0  ;;  %v1257_v17 = vsel %vm428_vm6, %v1252_v14, 0  ;;  %v1378_v23 = vpack.c.bf16 %v1785_v12, %v1785_v12 }
 0x4d4   :  { %1372 = vadd.xlane.f32.xlu1 %v1371_v3 }
 0x4d6   :  { %v1380_v19 = vpop.permute.xlu0 %1379 }
 0x4d7   :  { %v1385_v22 = vsel %vm428_vm6, %v1380_v19, 0  ;;  %v1771_v19 = vld [vmem:[#allocation8 + $0x8] sm:$0xff]  }
 0x4d8   :  { %984 = vadd.xlane.f32.xlu1 %v983_v6  ;;  %1716 = vmatpush3.bf16.msra.mxu1 %v1771_v19 }
 0x4d9   :  { %v1787_v13 = vpop.eup %1786 }
 0x4da   :  { %v1115_v15 = vsel %vm348_vm4, %v1787_v13, 0.0  ;;  %v1122_v16 = vpack.c.bf16 %v1787_v13, %v1787_v13 }
 0x4db   :  { %1116 = vadd.xlane.f32.xlu0 %v1115_v15 }
 0x4dc   :  { %1686 = vmatmul.mubr.msk.bf16.vlgmr.msra.gmra.mrb[28].mxu0 %vm348_vm4, %v1122_v16 }
 0x4dd   :  { %1696 = vmatpush3.bf16.msra.mxu0 %v1257_v17  ;;  %1697 = vmatprep.mubr.msk.bf16.mxu0 %vm1952_vm0, %v1951_v0 }
 0x4de   :  { %1707 = vmatprep.subr.bf16.mxu0 %v1951_v0 }
 0x4df   :  { %803 = vadd.xlane.f32.xlu0 %v802_v18 }
 0x4e3   :  { %414 = vadd.xlane.f32.xlu0 %v413_v20 }
 0x4e4   :  { %1698 = vmatmul.mubr.msk.bf16.vlgmr.msra.gmra.mrb[32].mxu0 %vm348_vm4, %v1250_v21 }
 0x4e5   :  { %1708 = vmatpush3.bf16.msra.mxu0 %v1385_v22  ;;  %1709 = vmatprep.mubr.msk.bf16.mxu0 %vm1952_vm0, %v1951_v0 }
 0x4ec   :  { %1710 = vmatmul.mubr.msk.bf16.vlgmr.msra.gmra.mrb[36].mxu0 %vm348_vm4, %v1378_v23 }
 0x52b   :  { %v548_v37 = vpop.xlane.xlu1 %547 }
 0x52c   :  { %1788 = vrcp.f32 %v548_v37 }
 0x533   :  { %v676_v36 = vpop.xlane.xlu0 %675 }
 0x536   :  { %v1789_v44 = vpop.eup %1788 }
 0x537   :  { %v550_v50 = vmul.f32 %v1789_v44, %v548_v37 }
 0x539   :  { %v551_v56 = vsub.f32 2.0, %v550_v50 }
 0x53b   :  { %v552_v61 = vmul.f32 %v1789_v44, %v551_v56 }
 0x55d   :  { %v1245_v41 = vpop.xlane.xlu1 %1244 }
 0x561   :  { %v1373_v48 = vpop.xlane.xlu1 %1372 }
 0x567   :  { %v2394_v24 = vpop.f32.mrb[8].mxu0 }
 0x568   :  { %v1627_v25 = vpop.f32.mrb[9].mxu0  ;;  %v1117_v38 = vpop.xlane.xlu0 %1116 }
 0x569   :  { %v469_v26 = vpop.f32.mrb[10].mxu0  ;;  %1790 = vrcp.f32 %v1117_v38 }
 0x56a   :  { %v1628_v27 = vpop.f32.mrb[11].mxu0  ;;  %1792 = vrcp.f32 %v676_v36 }
 0x56b   :  { %1794 = vrcp.f32 %v1245_v41 }
 0x56c   :  { %v804_v52 = vpop.xlane.xlu0 %803  ;;  %1796 = vrcp.f32 %v1373_v48 }
 0x56d   :  { %1798 = vrcp.f32 %v804_v52 }
 0x572   :  { %v596_v28 = vpop.f32.mrb[12].mxu0 }
 0x573   :  { %v1639_v29 = vpop.f32.mrb[13].mxu0  ;;  %v1791_v45 = vpop.eup %1790  ;;  %v602_v1 = vmul.f32 %v596_v28, %v552_v61 }
 0x574   :  { %v599_v30 = vpop.f32.mrb[14].mxu0  ;;  %v1119_v51 = vmul.f32 %v1791_v45, %v1117_v38  ;;  %v1793_v55 = vpop.eup %1792 }
 0x575   :  { %v1640_v31 = vpop.f32.mrb[15].mxu0  ;;  %v1795_v58 = vpop.eup %1794  ;;  %v678_v59 = vmul.f32 %v1793_v55, %v676_v36 }
 0x576   :  { %v1120_v57 = vsub.f32 2.0, %v1119_v51  ;;  %v1247_v60 = vmul.f32 %v1795_v58, %v1245_v41  ;;  %v1797_v7 = vpop.eup %1796 }
 0x577   :  { %v679_v8 = vsub.f32 2.0, %v678_v59  ;;  %v1799_v12 = vpop.eup %1798  ;;  %v1375_v3 = vmul.f32 %v1797_v7, %v1373_v48 }
 0x578   :  { %v1121_v62 = vmul.f32 %v1791_v45, %v1120_v57  ;;  %v1248_v9 = vsub.f32 2.0, %v1247_v60  ;;  %v806_v6 = vmul.f32 %v1799_v12, %v804_v52 }
 0x579   :  { %v680_v13 = vmul.f32 %v1793_v55, %v679_v8  ;;  %v1376_v21 = vsub.f32 2.0, %v1375_v3 }
 0x57a   :  { %v724_v33 = vpop.f32.mrb[16].mxu0  ;;  %v1249_v14 = vmul.f32 %v1795_v58, %v1248_v9  ;;  %v807_v22 = vsub.f32 2.0, %v806_v6 }
 0x57b   :  { %v1651_v47 = vpop.f32.mrb[17].mxu0  ;;  %v730_v16 = vmul.f32 %v724_v33, %v680_v13  ;;  %v1377_v27 = vmul.f32 %v1797_v7, %v1376_v21 }
 0x57c   :  { %v727_v34 = vpop.f32.mrb[18].mxu0  ;;  %v808_v26 = vmul.f32 %v1799_v12, %v807_v22 }
 0x57d   :  { %v1652_v35 = vpop.f32.mrb[19].mxu0  ;;  %v415_v34 = vpop.xlane.xlu0 %414 }
 0x57e   :  { %v985_v35 = vpop.xlane.xlu1 %984  ;;  %1800 = vrcp.f32 %v415_v34 }
 0x57f   :  { %1802 = vrcp.f32 %v985_v35 }
 0x588   :  { %v1801_v36 = vpop.eup %1800 }
 0x589   :  { %v1803_v37 = vpop.eup %1802  ;;  %v417_v38 = vmul.f32 %v1801_v36, %v415_v34 }
 0x58b   :  { %v418_v41 = vsub.f32 2.0, %v417_v38 }
 0x58d   :  { %v419_v44 = vmul.f32 %v1801_v36, %v418_v41 }
 0x58f   :  { %v472_v52 = vmul.f32 %v2394_v24, %v419_v44 }
 0x59c   :  { %v852_v39 = vpop.f32.mrb[20].mxu0 }
 0x59d   :  { %v1663_v40 = vpop.f32.mrb[21].mxu0  ;;  %v858_v28 = vmul.f32 %v852_v39, %v808_v26 }
 0x59e   :  { %v855_v42 = vpop.f32.mrb[22].mxu0  ;;  %v987_v40 = vmul.f32 %v1803_v37, %v985_v35 }
 0x59f   :  { %v1664_v43 = vpop.f32.mrb[23].mxu0 }
 0x5a0   :  { %v988_v42 = vsub.f32 2.0, %v987_v40 }
 0x5a2   :  { %v989_v45 = vmul.f32 %v1803_v37, %v988_v42 }
 0x5a4   :  { %v2396_v46 = vpop.f32.mrb[24].mxu0 }
 0x5a5   :  { %v1675_v49 = vpop.f32.mrb[25].mxu0 }
 0x5a6   :  { %v1038_v53 = vpop.f32.mrb[26].mxu0 }
 0x5a7   :  { %v1676_v54 = vpop.f32.mrb[27].mxu0  ;;  %v1041_v53 = vmul.f32 %v2396_v46, %v989_v45 }
 0x5af   :  { %v1165_v63 = vpop.f32.mrb[28].mxu0 }
 0x5b0   :  { %v1171_v2 = vmul.f32 %v1165_v63, %v1121_v62  ;;  %v1687_v32 = vpop.f32.mrb[29].mxu0 }
 0x5b1   :  { %v1168_v4 = vpop.f32.mrb[30].mxu0 }
 0x5b2   :  { %v1750_v10 = vpack.i.bf16 %v1171_v2, %v602_v1  ;;  %v1688_v11 = vpop.f32.mrb[31].mxu0 }
 0x5b4   :  { %1751 = vrot.lane.b32.xlu0 %v1750_v10, %s1961_s24 }
 0x5b7   :  { %v1293_v15 = vpop.f32.mrb[32].mxu0 }
 0x5b8   :  { %v1299_v17 = vmul.f32 %v1293_v15, %v1249_v14  ;;  %v1699_v18 = vpop.f32.mrb[33].mxu0 }
 0x5b9   :  { %v1296_v20 = vpop.f32.mrb[34].mxu0 }
 0x5ba   :  { %v1755_v23 = vpack.i.bf16 %v1299_v17, %v730_v16  ;;  %v1700_v25 = vpop.f32.mrb[35].mxu0 }
 0x5bc   :  { %1756 = vrot.lane.b32.xlu1 %v1755_v23, %s1969_s9 }
 0x5bf   :  { %v1421_v0 = vpop.f32.mrb[36].mxu0 }
 0x5c0   :  { %v1427_v29 = vmul.f32 %v1421_v0, %v1377_v27  ;;  %v1711_v30 = vpop.f32.mrb[37].mxu0 }
 0x5c1   :  { %v1424_v31 = vpop.f32.mrb[38].mxu0 }
 0x5c2   :  { %v1760_v47 = vpack.i.bf16 %v1427_v29, %v858_v28  ;;  %v1712_v33 = vpop.f32.mrb[39].mxu0 }
 0x5c4   :  { %1761 = vrot.lane.b32.xlu1 %v1760_v47, %s1970_s10 }
 0x626   :  { %v1752_v43 = vpop.permute.xlu0 %1751 }
 0x627   :  { %v1754_v48 = vunpack.i.h.bf16 %v1752_v43  ;;  %v1753_v49 = vunpack.i.l.bf16 %v1752_v43 }
 0x629   :  { %v1440_v55 = vsel %vm348_vm4, %v1041_v53, %v1754_v48  ;;  %v871_v56 = vsel %vm348_vm4, %v472_v52, %v1753_v49 }
 0x62e   :  { %v1757_v39 = vpop.permute.xlu1 %1756 }
 0x62f   :  { %v1759_v50 = vunpack.i.h.bf16 %v1757_v39  ;;  %v1758_v51 = vunpack.i.l.bf16 %v1757_v39 }
 0x631   :  { %v1441_v59 = vsel %vm230_vm2, %v1440_v55, %v1759_v50  ;;  %v872_v60 = vsel %vm230_vm2, %v871_v56, %v1758_v51 }
 0x636   :  { %v1762_v54 = vpop.permute.xlu1 %1761 }
 0x637   :  { %v1764_v57 = vunpack.i.h.bf16 %v1762_v54  ;;  %v1763_v58 = vunpack.i.l.bf16 %v1762_v54 }
 0x639   :  { %v1442_v61 = vsel %vm873_vm8, %v1441_v59, %v1764_v57  ;;  %v874_v62 = vsel %vm873_vm8, %v872_v60, %v1763_v58 }
 0x63a   :  { %v1443_v63 = vpack.c.bf16 %v1442_v61, %v874_v62 }
 0x63c   :  { %1718 = vmatmul.mubr.msk.bf16.vlgmr.msra.gmra.mrb[36].mxu1 %vm113_vm1, %v1443_v63 }
 0x70f   :  { %v1497_v24 = vpop.f32.mrb[36].mxu1 }
 0x710   :  { %1504 = vst.msk [vmem:[#allocation11] sm:$0xff] %vm113_vm1, %v1497_v24  ;;  %v1719_v46 = vpop.f32.mrb[37].mxu1 }
 0x711   :  { %v1500_v1 = vpop.f32.mrb[38].mxu1 }
 0x712   :  { %1505 = vst.msk [vmem:[#allocation11 + $0x8] sm:$0xff] %vm113_vm1, %v1500_v1  ;;  %v1720_v2 = vpop.f32.mrb[39].mxu1 }
 0x713   :  { %1925 = shalt.err (!%p1922_p2)
}
 0x714   :  { %s1926_s13 = scalar_lea.hbm %s2429_s7, 256 }
 0x715   :  { %p1927_p3 = scmp.ne.s32.totalorder %s2429_s7, %s1926_s13  ;;  %p1930_p4 = scmp.lt.u32.totalorder %s1926_s13, %s2429_s7 }
 0x717   :  { %p1932_p5 = pnand %p1930_p4, %p1927_p3 }
 0x719   :  { %1935 = shalt.err (!%p1932_p5)
}
 0x71a   :  { %s1972_s27 = smov 128  }
 0x71b   :  { %1517 = dma.vmem_to_hbm [thread:$0]  %s1512_s12, 256, %s2429_s7, [#allocation4], %s1972_s27, %s1972_s27, %s1961_s24  }
 0x71c   :  { %1942 = dma.done.wait [#allocation4], 256  }
 0x71d   :  { %1943 = vsyncadd [#allocation4], 4294967040 }
 0x71e   :  { %1521 = vsyncpa [#allocation3], 1 }
 0x71f   :  { %1522 = vsyncpa [#allocation6], 1 }
 0x720   :  { %1523 = vsyncpa [#allocation9], 1 }
 0x721   :  { %1524 = vsyncpa [#allocation4], 1 }

</bundles_post_ra>
